<compile_context>
chip_gen: v6e
topology: v6e:2x2x1
jax: 0.10.0
libtpu: 0.0.40
codegen_flags: <defaults>
</compile_context>

<pallas_src>
import functools

import numpy as np
import jax
import jax.numpy as jnp
from jax import lax
from jax.experimental import pallas as pl
from jax.experimental.pallas import tpu as pltpu


# ---------------------------------------------------------------------------
# Static tap / mask helpers (pure Python / trace-time)
# ---------------------------------------------------------------------------
def _conv_taps(H, W, d):
    """Taps of a (3, 2) kernel with dilation d, H padded by d on both sides
    and W padded by d on the left only (causal).  Returns [(tap, oh, ow)]:
    the tap reads x[h + oh, w + ow].  Taps that can only ever read zero
    padding are pruned statically."""
    taps = []
    for kh in range(3):
        for kw in range(2):
            oh, ow = (kh - 1) * d, (kw - 1) * d
            if abs(oh) >= H or ow <= -W:          # entirely inside padding
                continue
            taps.append((kh * 2 + kw, oh, ow))
    return taps


def _offset_mask(H, W, oh, ow):
    """(HW,) 0/1 mask: 1 where (h+oh, w+ow) is a valid in-range source for
    the flattened position p = h*W + w."""
    p = np.arange(H * W)
    h, w = p // W, p % W
    valid = (h + oh >= 0) & (h + oh < H) & (w + ow >= 0) & (w + ow < W)
    return valid.astype(np.float32)


# ---------------------------------------------------------------------------
# The fused dilated-dense-block kernel (one grid step == one batch sample)
# ---------------------------------------------------------------------------
def _make_kernel(H, W, half, n_layers, io_taps, layer_taps, mask_index):
    HW = H * W

    def kernel(x_ref, masks_ref, w_in_ref, b_in_ref, w_out_ref, b_out_ref,
               wl0, wl1, wl2, wl3, wl4, wl5,
               bl_ref, gamma_ref, beta_ref, alpha_ref,
               o_ref, cat_ref):
        wl_refs = (wl0, wl1, wl2, wl3, wl4, wl5)

        def shifted(x, oh, ow):
            # out[:, h*W+w] == x[:, (h+oh)*W + (w+ow)]  (0 when out of range)
            # Lane rotate on the XLU + static 0/1 mask on the VPU.
            if oh == 0 and ow == 0:
                return x
            s = oh * W + ow
            rolled = pltpu.roll(x, (-s) % HW, axis=1)
            j = mask_index[(oh, ow)]
            return rolled * masks_ref[j:j + 1, :]

        def conv_fused(x, taps, w, b):
            # One K-concatenated MXU matmul over all live taps.
            slabs = [shifted(x, oh, ow) for (_, oh, ow) in taps]
            xbig = slabs[0] if len(slabs) == 1 else jnp.concatenate(slabs, 0)
            return jnp.dot(w, xbig, preferred_element_type=jnp.float32) + b

        def prelu(z, a):
            return jnp.where(z >= 0.0, z, a * z)

        # input layer: causal (3,2) conv, d=1 -> half channels, then PReLU
        x0 = prelu(conv_fused(x_ref[0], io_taps, w_in_ref[...], b_in_ref[...]),
                   alpha_ref[0])
        cat_ref[0:half, :] = x0          # dense-skip slab, oldest-first order

        feat = x0
        for i in range(n_layers):
            cin = half * (i + 1)
            xcat = cat_ref[0:cin, :]      # [x0, out1, ..., out_i]
            # fused grouped dilated conv + group pooling + 1x1 conv (weights
            # folded and column-permuted to cat order at trace time)
            y = conv_fused(xcat, layer_taps[i], wl_refs[i][...], bl_ref[i])
            # GroupNorm(1, half, eps=1e-8) over the whole sample, then PReLU
            mean = jnp.mean(y)
            yc = y - mean
            var = jnp.mean(yc * yc)
            z = yc * (lax.rsqrt(var + 1e-8) * gamma_ref[i]) + beta_ref[i]
            feat = prelu(z, alpha_ref[i + 1])
            if i + 1 < n_layers:          # each feature is stored exactly once
                cat_ref[(i + 1) * half:(i + 2) * half, :] = feat

        # output layer: causal (3,2) conv, d=1 -> out_ch channels, then PReLU
        out = conv_fused(feat, io_taps, w_out_ref[...], b_out_ref[...])
        o_ref[0] = prelu(out, alpha_ref[n_layers + 1])

    return kernel


# ---------------------------------------------------------------------------
# Wrapper: trace-time weight folding + the single pallas_call
# ---------------------------------------------------------------------------
def dilated_dense_block(params, x):
    B, in_ch, H, W = x.shape
    HW = H * W
    half = in_ch // 2
    layers = params["layers"]
    n_layers = len(layers)
    out_ch = params["out_w"].shape[0]
    assert in_ch % 2 == 0 and n_layers == 6

    io_taps = _conv_taps(H, W, 1)
    layer_taps = [_conv_taps(H, W, 2 ** i) for i in range(n_layers)]

    # distinct non-identity (oh, ow) offsets -> one precomputed lane mask each
    mask_index, mask_rows = {}, []
    for taps in [io_taps] + layer_taps:
        for _, oh, ow in taps:
            if (oh, ow) == (0, 0) or (oh, ow) in mask_index:
                continue
            mask_index[(oh, ow)] = len(mask_rows)
            mask_rows.append(_offset_mask(H, W, oh, ow))
    masks = jnp.asarray(np.stack(mask_rows) if mask_rows
                        else np.zeros((1, HW), np.float32))

    f32 = jnp.float32

    def io_weight(w):                     # (co, ci, 3, 2) -> (co, n_taps*ci)
        w = w.astype(f32)
        return jnp.concatenate(
            [w[:, :, t // 2, t % 2] for (t, _, _) in io_taps], axis=1)

    w_in_f = io_weight(params["in_w"])
    b_in = params["in_b"].reshape(half, 1).astype(f32)
    w_out_f = io_weight(params["out_w"])
    b_out = params["out_b"].reshape(out_ch, 1).astype(f32)

    # Per layer, fold grouped conv + group pooling + 1x1 conv into one dense
    # weight per tap (columns permuted from torch-concat order to the
    # oldest-first cat order), and fold the biases: b_fused = w1 @ bg + b1.
    wl_list, bl_list = [], []
    for i, l in enumerate(layers):
        cpg = i + 1
        cin = half * cpg
        wg = l["wg"].astype(f32)                        # (half, cpg, 3, 2)
        w1 = l["w1"].reshape(half, half).astype(f32)
        bg = l["bg"].reshape(half).astype(f32)
        b1 = l["b1"].reshape(half).astype(f32)
        k = np.arange(cin)
        g, c = k // cpg, k % cpg          # torch-concat channel -> (group, in-group)
        m = np.arange(cin)
        perm = (i - m // half) * half + (m % half)      # cat ch -> torch ch
        blocks = []
        for (t, _, _) in layer_taps[i]:
            kh, kw = t // 2, t % 2
            wt = w1[:, g] * wg[g, c, kh, kw][None, :]   # (half, cin) torch order
            blocks.append(wt[:, perm])                  # -> cat order
        wl_list.append(jnp.concatenate(blocks, axis=1))  # (half, n_taps*cin)
        bl_list.append((w1 @ bg + b1).reshape(half, 1))
    bl = jnp.stack(bl_list)                              # (6, half, 1)
    gamma = jnp.stack([l["gamma"].reshape(half, 1).astype(f32) for l in layers])
    beta = jnp.stack([l["beta"].reshape(half, 1).astype(f32) for l in layers])
    alphas = jnp.stack([params["alpha1"]] + [l["alpha"] for l in layers]
                       + [params["alpha2"]]).astype(f32)          # (8,) SMEM

    x_flat = x.reshape(B, in_ch, HW).astype(f32)

    def const_spec(arr):
        nd = arr.ndim
        return pl.BlockSpec(arr.shape, lambda b, _nd=nd: (0,) * _nd)

    in_specs = ([pl.BlockSpec((1, in_ch, HW), lambda b: (b, 0, 0)),
                 const_spec(masks),
                 const_spec(w_in_f), const_spec(b_in),
                 const_spec(w_out_f), const_spec(b_out)]
                + [const_spec(w) for w in wl_list]
                + [const_spec(bl), const_spec(gamma), const_spec(beta),
                   pl.BlockSpec(memory_space=pltpu.MemorySpace.SMEM)])

    kernel = _make_kernel(H, W, half, n_layers, io_taps, layer_taps, mask_index)

    out = pl.pallas_call(
        kernel,
        out_shape=jax.ShapeDtypeStruct((B, out_ch, HW), jnp.float32),
        grid=(B,),
        in_specs=in_specs,
        out_specs=pl.BlockSpec((1, out_ch, HW), lambda b: (b, 0, 0)),
        scratch_shapes=[pltpu.VMEM((half * n_layers, HW), jnp.float32)],
        compiler_params=pltpu.CompilerParams(
            dimension_semantics=("parallel",)),
    )(x_flat, masks, w_in_f, b_in, w_out_f, b_out,
      *wl_list, bl, gamma, beta, alphas)

    return out.reshape(B, out_ch, H, W)


# ---------------------------------------------------------------------------
# Deterministic synthetic parameters (PyTorch-native shapes)
# ---------------------------------------------------------------------------
def _init_conv(key, cout, cin, kh, kw):
    kw_key, kb_key = jax.random.split(key)
    fan_in = float(cin * kh * kw)
    w = jax.random.normal(kw_key, (cout, cin, kh, kw), jnp.float32) \
        / jnp.sqrt(fan_in)
    b = jax.random.normal(kb_key, (cout,), jnp.float32) * 0.01
    return w, b


def init_params(key, in_ch, out_ch, n_layers=6):
    half = in_ch // 2
    keys = iter(jax.random.split(key, 2 * n_layers + 4))
    alpha0 = jnp.float32(0.25)                      # nn.PReLU() default init

    params = {}
    params["in_w"], params["in_b"] = _init_conv(next(keys), half, in_ch, 3, 2)
    params["alpha1"] = alpha0
    layers = []
    for i in range(n_layers):
        cpg = i + 1                                  # channels per group
        wg, bg = _init_conv(next(keys), half, cpg, 3, 2)   # grouped (G,cpg,3,2)
        w1, b1 = _init_conv(next(keys), half, half, 1, 1)  # 1x1 conv
        layers.append(dict(wg=wg, bg=bg, w1=w1, b1=b1,
                           gamma=jnp.ones(half, jnp.float32),
                           beta=jnp.zeros(half, jnp.float32),
                           alpha=alpha0))
    params["layers"] = layers
    params["out_w"], params["out_b"] = _init_conv(next(keys), out_ch, half, 3, 2)
    params["alpha2"] = alpha0
    return params


# ---------------------------------------------------------------------------
# Pure-JAX (XLA) reference of the PyTorch module, for a correctness check
# ---------------------------------------------------------------------------
def reference_forward(params, x):
    half = params["in_w"].shape[0]

    def conv(x, w, b, dil=1, pad_h=0, pad_w=0, groups=1):
        xp = jnp.pad(x, ((0, 0), (0, 0), (pad_h, pad_h), (pad_w, 0)))
        y = lax.conv_general_dilated(
            xp, w, window_strides=(1, 1), padding="VALID",
            rhs_dilation=(dil, dil),
            dimension_numbers=("NCHW", "OIHW", "NCHW"),
            feature_group_count=groups,
            precision=lax.Precision.HIGHEST)
        return y + b[None, :, None, None]

    def gn_prelu(y, gamma, beta, alpha):
        mean = jnp.mean(y, axis=(1, 2, 3), keepdims=True)
        var = jnp.mean(jnp.square(y - mean), axis=(1, 2, 3), keepdims=True)
        z = (y - mean) / jnp.sqrt(var + 1e-8)
        z = z * gamma[None, :, None, None] + beta[None, :, None, None]
        return jnp.where(z >= 0, z, alpha * z)

    def prelu(y, alpha):
        return jnp.where(y >= 0, y, alpha * y)

    h = conv(x, params["in_w"], params["in_b"], dil=1, pad_h=1, pad_w=1)
    h = prelu(h, params["alpha1"])
    feats = [h]
    for i, l in enumerate(params["layers"]):
        d = 2 ** i
        xin = jnp.concatenate(feats, axis=1)
        g = conv(xin, l["wg"], l["bg"], dil=d, pad_h=d, pad_w=d, groups=half)
        g = conv(g, l["w1"], l["b1"])
        feats = [gn_prelu(g, l["gamma"], l["beta"], l["alpha"])] + feats
    h = conv(feats[0], params["out_w"], params["out_b"], dil=1, pad_h=1, pad_w=1)
    return prelu(h, params["alpha2"])


# ---------------------------------------------------------------------------
if __name__ == "__main__":
    key = jax.random.PRNGKey(0)
    kp, kx = jax.random.split(key)

    B, in_ch, out_ch = 2, 16, 16        # half = 8 (sublane aligned)
    H, W = 16, 8                        # H*W = 128 -> lane-dense slabs
    n_layers = 6                        # the reference forward uses layers[0..5]

    params = init_params(kp, in_ch, out_ch, n_layers)
    x = jax.random.normal(kx, (B, in_ch, H, W), jnp.float32)

    fwd = jax.jit(functools.partial(dilated_dense_block, params))
    out = jax.block_until_ready(fwd(x))

    assert out.shape == (B, out_ch, H, W), out.shape
    assert bool(jnp.all(jnp.isfinite(out)))

    ref = jax.jit(functools.partial(reference_forward, params))(x)
    err = float(jnp.max(jnp.abs(out - ref)))
    assert err < 2e-4, f"mismatch vs pure-JAX reference: max abs err={err}"

    print("KERNEL_OK")
</pallas_src>

<mosaic_0001>
module attributes {stable_mosaic.version = 11 : i64} {
  func.func @kernel(%arg0: i32, %arg1: memref<1x16x128xf32, #tpu.memory_space<vmem>>, %arg2: memref<17x128xf32, #tpu.memory_space<vmem>>, %arg3: memref<8x96xf32, #tpu.memory_space<vmem>>, %arg4: memref<8x1xf32, #tpu.memory_space<vmem>>, %arg5: memref<16x48xf32, #tpu.memory_space<vmem>>, %arg6: memref<16x1xf32, #tpu.memory_space<vmem>>, %arg7: memref<8x48xf32, #tpu.memory_space<vmem>>, %arg8: memref<8x96xf32, #tpu.memory_space<vmem>>, %arg9: memref<8x144xf32, #tpu.memory_space<vmem>>, %arg10: memref<8x96xf32, #tpu.memory_space<vmem>>, %arg11: memref<8x40xf32, #tpu.memory_space<vmem>>, %arg12: memref<8x48xf32, #tpu.memory_space<vmem>>, %arg13: memref<6x8x1xf32, #tpu.memory_space<vmem>>, %arg14: memref<6x8x1xf32, #tpu.memory_space<vmem>>, %arg15: memref<6x8x1xf32, #tpu.memory_space<vmem>>, %arg16: memref<8xf32, #tpu.memory_space<smem>>, %arg17: memref<1x16x128xf32, #tpu.memory_space<vmem>>, %arg18: memref<48x128xf32, #tpu.memory_space<vmem>>) attributes {dimension_semantics = [#tpu.dimension_semantics<parallel>], iteration_bounds = array<i64: 2>, scalar_prefetch = 0 : i64, scratch_operands = 1 : i64, tpu.core_type = #tpu.core_type<tc>, window_params = [{transform_indices = @transform_0, window_bounds = array<i64: 1, 16, 128>}, {pipeline_mode = #tpu.pipeline_mode<synchronous>, transform_indices = @transform_1, window_bounds = array<i64: 17, 128>}, {pipeline_mode = #tpu.pipeline_mode<synchronous>, transform_indices = @transform_2, window_bounds = array<i64: 8, 96>}, {pipeline_mode = #tpu.pipeline_mode<synchronous>, transform_indices = @transform_3, window_bounds = array<i64: 8, 1>}, {pipeline_mode = #tpu.pipeline_mode<synchronous>, transform_indices = @transform_4, window_bounds = array<i64: 16, 48>}, {pipeline_mode = #tpu.pipeline_mode<synchronous>, transform_indices = @transform_5, window_bounds = array<i64: 16, 1>}, {pipeline_mode = #tpu.pipeline_mode<synchronous>, transform_indices = @transform_6, window_bounds = array<i64: 8, 48>}, {pipeline_mode = #tpu.pipeline_mode<synchronous>, transform_indices = @transform_7, window_bounds = array<i64: 8, 96>}, {pipeline_mode = #tpu.pipeline_mode<synchronous>, transform_indices = @transform_8, window_bounds = array<i64: 8, 144>}, {pipeline_mode = #tpu.pipeline_mode<synchronous>, transform_indices = @transform_9, window_bounds = array<i64: 8, 96>}, {pipeline_mode = #tpu.pipeline_mode<synchronous>, transform_indices = @transform_10, window_bounds = array<i64: 8, 40>}, {pipeline_mode = #tpu.pipeline_mode<synchronous>, transform_indices = @transform_11, window_bounds = array<i64: 8, 48>}, {pipeline_mode = #tpu.pipeline_mode<synchronous>, transform_indices = @transform_12, window_bounds = array<i64: 6, 8, 1>}, {pipeline_mode = #tpu.pipeline_mode<synchronous>, transform_indices = @transform_13, window_bounds = array<i64: 6, 8, 1>}, {pipeline_mode = #tpu.pipeline_mode<synchronous>, transform_indices = @transform_14, window_bounds = array<i64: 6, 8, 1>}, {transform_indices = @transform_15, window_bounds = array<i64: 8>}, {transform_indices = @transform_16, window_bounds = array<i64: 1, 16, 128>}]} {
    %c0 = arith.constant 0 : index
    %c0_0 = arith.constant 0 : index
    %c0_1 = arith.constant 0 : index
    %0 = vector.load %arg1[%c0, %c0_0, %c0_1] : memref<1x16x128xf32, #tpu.memory_space<vmem>>, vector<1x16x128xf32>
    %1 = vector.shape_cast %0 : vector<1x16x128xf32> to vector<16x128xf32>
    %c0_2 = arith.constant 0 : index
    %c0_3 = arith.constant 0 : index
    %2 = vector.load %arg3[%c0_2, %c0_3] : memref<8x96xf32, #tpu.memory_space<vmem>>, vector<8x96xf32>
    %c0_4 = arith.constant 0 : index
    %c0_5 = arith.constant 0 : index
    %3 = vector.load %arg4[%c0_4, %c0_5] : memref<8x1xf32, #tpu.memory_space<vmem>>, vector<8x1xf32>
    %c9_i32 = arith.constant 9 : i32
    %4 = tpu.dynamic_rotate %1 by %c9_i32 dim 1 : vector<16x128xf32>, i32 -> vector<16x128xf32>
    %c0_6 = arith.constant 0 : index
    %c0_7 = arith.constant 0 : index
    %5 = vector.load %arg2[%c0_6, %c0_7] : memref<17x128xf32, #tpu.memory_space<vmem>>, vector<1x128xf32>
    %6 = vector.broadcast %5 : vector<1x128xf32> to vector<16x128xf32>
    %7 = arith.mulf %4, %6 : vector<16x128xf32>
    %c8_i32 = arith.constant 8 : i32
    %8 = tpu.dynamic_rotate %1 by %c8_i32 dim 1 : vector<16x128xf32>, i32 -> vector<16x128xf32>
    %c1 = arith.constant 1 : index
    %c0_8 = arith.constant 0 : index
    %9 = vector.load %arg2[%c1, %c0_8] : memref<17x128xf32, #tpu.memory_space<vmem>>, vector<1x128xf32>
    %10 = vector.broadcast %9 : vector<1x128xf32> to vector<16x128xf32>
    %11 = arith.mulf %8, %10 : vector<16x128xf32>
    %c1_i32 = arith.constant 1 : i32
    %12 = tpu.dynamic_rotate %1 by %c1_i32 dim 1 : vector<16x128xf32>, i32 -> vector<16x128xf32>
    %c2 = arith.constant 2 : index
    %c0_9 = arith.constant 0 : index
    %13 = vector.load %arg2[%c2, %c0_9] : memref<17x128xf32, #tpu.memory_space<vmem>>, vector<1x128xf32>
    %14 = vector.broadcast %13 : vector<1x128xf32> to vector<16x128xf32>
    %15 = arith.mulf %12, %14 : vector<16x128xf32>
    %c121_i32 = arith.constant 121 : i32
    %16 = tpu.dynamic_rotate %1 by %c121_i32 dim 1 : vector<16x128xf32>, i32 -> vector<16x128xf32>
    %c3 = arith.constant 3 : index
    %c0_10 = arith.constant 0 : index
    %17 = vector.load %arg2[%c3, %c0_10] : memref<17x128xf32, #tpu.memory_space<vmem>>, vector<1x128xf32>
    %18 = vector.broadcast %17 : vector<1x128xf32> to vector<16x128xf32>
    %19 = arith.mulf %16, %18 : vector<16x128xf32>
    %c120_i32 = arith.constant 120 : i32
    %20 = tpu.dynamic_rotate %1 by %c120_i32 dim 1 : vector<16x128xf32>, i32 -> vector<16x128xf32>
    %c4 = arith.constant 4 : index
    %c0_11 = arith.constant 0 : index
    %21 = vector.load %arg2[%c4, %c0_11] : memref<17x128xf32, #tpu.memory_space<vmem>>, vector<1x128xf32>
    %22 = vector.broadcast %21 : vector<1x128xf32> to vector<16x128xf32>
    %23 = arith.mulf %20, %22 : vector<16x128xf32>
    %24 = tpu.concatenate %7, %11, %15, %1, %19, %23 in 0 : vector<16x128xf32>, vector<16x128xf32>, vector<16x128xf32>, vector<16x128xf32>, vector<16x128xf32>, vector<16x128xf32> -> vector<96x128xf32>
    %cst = arith.constant dense<0.000000e+00> : vector<8x128xf32>
    %25 = tpu.matmul %2, %24, %cst {dimension_numbers = #tpu.dot_dimension_numbers<[1], [0], [0], [1], [0, 0, 1, 1], [], []>} : vector<8x96xf32>, vector<96x128xf32>, vector<8x128xf32> -> vector<8x128xf32>
    %26 = vector.broadcast %3 : vector<8x1xf32> to vector<8x128xf32>
    %27 = arith.addf %25, %26 : vector<8x128xf32>
    %c0_12 = arith.constant 0 : index
    %28 = memref.load %arg16[%c0_12] : memref<8xf32, #tpu.memory_space<smem>>
    %cst_13 = arith.constant 0.000000e+00 : f32
    %29 = vector.broadcast %cst_13 : f32 to vector<8x128xf32>
    %30 = arith.cmpf oge, %27, %29 : vector<8x128xf32>
    %31 = vector.broadcast %28 : f32 to vector<8x128xf32>
    %32 = arith.mulf %31, %27 : vector<8x128xf32>
    %33 = arith.select %30, %27, %32 : vector<8x128xi1>, vector<8x128xf32>
    %c0_14 = arith.constant 0 : index
    %c0_15 = arith.constant 0 : index
    %34 = vector.load %arg18[%c0_14, %c0_15] : memref<48x128xf32, #tpu.memory_space<vmem>>, vector<8x128xf32>
    tpu.vector_store %arg18[%c0_14, %c0_15], %33 {strides = array<i32>} : memref<48x128xf32, #tpu.memory_space<vmem>>, vector<8x128xf32>,
    %c0_16 = arith.constant 0 : index
    %c0_17 = arith.constant 0 : index
    %35 = vector.load %arg18[%c0_16, %c0_17] : memref<48x128xf32, #tpu.memory_space<vmem>>, vector<8x128xf32>
    %c0_18 = arith.constant 0 : index
    %c0_19 = arith.constant 0 : index
    %36 = vector.load %arg7[%c0_18, %c0_19] : memref<8x48xf32, #tpu.memory_space<vmem>>, vector<8x48xf32>
    %c0_20 = arith.constant 0 : index
    %c0_21 = arith.constant 0 : index
    %c0_22 = arith.constant 0 : index
    %37 = vector.load %arg13[%c0_20, %c0_21, %c0_22] : memref<6x8x1xf32, #tpu.memory_space<vmem>>, vector<1x8x1xf32>
    %38 = vector.shape_cast %37 : vector<1x8x1xf32> to vector<8x1xf32>
    %c9_i32_23 = arith.constant 9 : i32
    %39 = tpu.dynamic_rotate %35 by %c9_i32_23 dim 1 : vector<8x128xf32>, i32 -> vector<8x128xf32>
    %c0_24 = arith.constant 0 : index
    %c0_25 = arith.constant 0 : index
    %40 = vector.load %arg2[%c0_24, %c0_25] : memref<17x128xf32, #tpu.memory_space<vmem>>, vector<1x128xf32>
    %41 = vector.broadcast %40 : vector<1x128xf32> to vector<8x128xf32>
    %42 = arith.mulf %39, %41 : vector<8x128xf32>
    %c8_i32_26 = arith.constant 8 : i32
    %43 = tpu.dynamic_rotate %35 by %c8_i32_26 dim 1 : vector<8x128xf32>, i32 -> vector<8x128xf32>
    %c1_27 = arith.constant 1 : index
    %c0_28 = arith.constant 0 : index
    %44 = vector.load %arg2[%c1_27, %c0_28] : memref<17x128xf32, #tpu.memory_space<vmem>>, vector<1x128xf32>
    %45 = vector.broadcast %44 : vector<1x128xf32> to vector<8x128xf32>
    %46 = arith.mulf %43, %45 : vector<8x128xf32>
    %c1_i32_29 = arith.constant 1 : i32
    %47 = tpu.dynamic_rotate %35 by %c1_i32_29 dim 1 : vector<8x128xf32>, i32 -> vector<8x128xf32>
    %c2_30 = arith.constant 2 : index
    %c0_31 = arith.constant 0 : index
    %48 = vector.load %arg2[%c2_30, %c0_31] : memref<17x128xf32, #tpu.memory_space<vmem>>, vector<1x128xf32>
    %49 = vector.broadcast %48 : vector<1x128xf32> to vector<8x128xf32>
    %50 = arith.mulf %47, %49 : vector<8x128xf32>
    %c121_i32_32 = arith.constant 121 : i32
    %51 = tpu.dynamic_rotate %35 by %c121_i32_32 dim 1 : vector<8x128xf32>, i32 -> vector<8x128xf32>
    %c3_33 = arith.constant 3 : index
    %c0_34 = arith.constant 0 : index
    %52 = vector.load %arg2[%c3_33, %c0_34] : memref<17x128xf32, #tpu.memory_space<vmem>>, vector<1x128xf32>
    %53 = vector.broadcast %52 : vector<1x128xf32> to vector<8x128xf32>
    %54 = arith.mulf %51, %53 : vector<8x128xf32>
    %c120_i32_35 = arith.constant 120 : i32
    %55 = tpu.dynamic_rotate %35 by %c120_i32_35 dim 1 : vector<8x128xf32>, i32 -> vector<8x128xf32>
    %c4_36 = arith.constant 4 : index
    %c0_37 = arith.constant 0 : index
    %56 = vector.load %arg2[%c4_36, %c0_37] : memref<17x128xf32, #tpu.memory_space<vmem>>, vector<1x128xf32>
    %57 = vector.broadcast %56 : vector<1x128xf32> to vector<8x128xf32>
    %58 = arith.mulf %55, %57 : vector<8x128xf32>
    %59 = tpu.concatenate %42, %46, %50, %35, %54, %58 in 0 : vector<8x128xf32>, vector<8x128xf32>, vector<8x128xf32>, vector<8x128xf32>, vector<8x128xf32>, vector<8x128xf32> -> vector<48x128xf32>
    %cst_38 = arith.constant dense<0.000000e+00> : vector<8x128xf32>
    %60 = tpu.matmul %36, %59, %cst_38 {dimension_numbers = #tpu.dot_dimension_numbers<[1], [0], [0], [1], [0, 0, 1, 1], [], []>} : vector<8x48xf32>, vector<48x128xf32>, vector<8x128xf32> -> vector<8x128xf32>
    %61 = vector.broadcast %38 : vector<8x1xf32> to vector<8x128xf32>
    %62 = arith.addf %60, %61 : vector<8x128xf32>
    %63 = vector.shape_cast %62 : vector<8x128xf32> to vector<1x8x128xf32>
    %cst_39 = arith.constant dense<0.000000e+00> : vector<1xf32>
    %64 = vector.multi_reduction <add>, %63, %cst_39 [1, 2] : vector<1x8x128xf32> to vector<1xf32>
    %65 = vector.shape_cast %64 : vector<1xf32> to vector<1x1x1xf32>
    %66 = vector.extract %65[0, 0, 0] : f32 from vector<1x1x1xf32>
    %cst_40 = arith.constant 1.024000e+03 : f32
    %67 = arith.divf %66, %cst_40 : f32
    %68 = vector.broadcast %67 : f32 to vector<8x128xf32>
    %69 = arith.subf %62, %68 : vector<8x128xf32>
    %70 = arith.mulf %69, %69 : vector<8x128xf32>
    %71 = vector.shape_cast %70 : vector<8x128xf32> to vector<1x8x128xf32>
    %cst_41 = arith.constant dense<0.000000e+00> : vector<1xf32>
    %72 = vector.multi_reduction <add>, %71, %cst_41 [1, 2] : vector<1x8x128xf32> to vector<1xf32>
    %73 = vector.shape_cast %72 : vector<1xf32> to vector<1x1x1xf32>
    %74 = vector.extract %73[0, 0, 0] : f32 from vector<1x1x1xf32>
    %cst_42 = arith.constant 1.024000e+03 : f32
    %75 = arith.divf %74, %cst_42 : f32
    %cst_43 = arith.constant 9.99999993E-9 : f32
    %76 = arith.addf %75, %cst_43 : f32
    %77 = math.rsqrt %76 : f32
    %c0_44 = arith.constant 0 : index
    %c0_45 = arith.constant 0 : index
    %c0_46 = arith.constant 0 : index
    %78 = vector.load %arg14[%c0_44, %c0_45, %c0_46] : memref<6x8x1xf32, #tpu.memory_space<vmem>>, vector<1x8x1xf32>
    %79 = vector.shape_cast %78 : vector<1x8x1xf32> to vector<8x1xf32>
    %80 = vector.broadcast %77 : f32 to vector<8x1xf32>
    %81 = arith.mulf %80, %79 : vector<8x1xf32>
    %82 = vector.broadcast %81 : vector<8x1xf32> to vector<8x128xf32>
    %83 = arith.mulf %69, %82 : vector<8x128xf32>
    %c0_47 = arith.constant 0 : index
    %c0_48 = arith.constant 0 : index
    %c0_49 = arith.constant 0 : index
    %84 = vector.load %arg15[%c0_47, %c0_48, %c0_49] : memref<6x8x1xf32, #tpu.memory_space<vmem>>, vector<1x8x1xf32>
    %85 = vector.shape_cast %84 : vector<1x8x1xf32> to vector<8x1xf32>
    %86 = vector.broadcast %85 : vector<8x1xf32> to vector<8x128xf32>
    %87 = arith.addf %83, %86 : vector<8x128xf32>
    %c1_50 = arith.constant 1 : index
    %88 = memref.load %arg16[%c1_50] : memref<8xf32, #tpu.memory_space<smem>>
    %cst_51 = arith.constant 0.000000e+00 : f32
    %89 = vector.broadcast %cst_51 : f32 to vector<8x128xf32>
    %90 = arith.cmpf oge, %87, %89 : vector<8x128xf32>
    %91 = vector.broadcast %88 : f32 to vector<8x128xf32>
    %92 = arith.mulf %91, %87 : vector<8x128xf32>
    %93 = arith.select %90, %87, %92 : vector<8x128xi1>, vector<8x128xf32>
    %c8 = arith.constant 8 : index
    %c0_52 = arith.constant 0 : index
    %94 = vector.load %arg18[%c8, %c0_52] : memref<48x128xf32, #tpu.memory_space<vmem>>, vector<8x128xf32>
    tpu.vector_store %arg18[%c8, %c0_52], %93 {strides = array<i32>} : memref<48x128xf32, #tpu.memory_space<vmem>>, vector<8x128xf32>,
    %c0_53 = arith.constant 0 : index
    %c0_54 = arith.constant 0 : index
    %95 = vector.load %arg18[%c0_53, %c0_54] : memref<48x128xf32, #tpu.memory_space<vmem>>, vector<16x128xf32>
    %c0_55 = arith.constant 0 : index
    %c0_56 = arith.constant 0 : index
    %96 = vector.load %arg8[%c0_55, %c0_56] : memref<8x96xf32, #tpu.memory_space<vmem>>, vector<8x96xf32>
    %c1_57 = arith.constant 1 : index
    %c0_58 = arith.constant 0 : index
    %c0_59 = arith.constant 0 : index
    %97 = vector.load %arg13[%c1_57, %c0_58, %c0_59] : memref<6x8x1xf32, #tpu.memory_space<vmem>>, vector<1x8x1xf32>
    %98 = vector.shape_cast %97 : vector<1x8x1xf32> to vector<8x1xf32>
    %c18_i32 = arith.constant 18 : i32
    %99 = tpu.dynamic_rotate %95 by %c18_i32 dim 1 : vector<16x128xf32>, i32 -> vector<16x128xf32>
    %c5 = arith.constant 5 : index
    %c0_60 = arith.constant 0 : index
    %100 = vector.load %arg2[%c5, %c0_60] : memref<17x128xf32, #tpu.memory_space<vmem>>, vector<1x128xf32>
    %101 = vector.broadcast %100 : vector<1x128xf32> to vector<16x128xf32>
    %102 = arith.mulf %99, %101 : vector<16x128xf32>
    %c16_i32 = arith.constant 16 : i32
    %103 = tpu.dynamic_rotate %95 by %c16_i32 dim 1 : vector<16x128xf32>, i32 -> vector<16x128xf32>
    %c6 = arith.constant 6 : index
    %c0_61 = arith.constant 0 : index
    %104 = vector.load %arg2[%c6, %c0_61] : memref<17x128xf32, #tpu.memory_space<vmem>>, vector<1x128xf32>
    %105 = vector.broadcast %104 : vector<1x128xf32> to vector<16x128xf32>
    %106 = arith.mulf %103, %105 : vector<16x128xf32>
    %c2_i32 = arith.constant 2 : i32
    %107 = tpu.dynamic_rotate %95 by %c2_i32 dim 1 : vector<16x128xf32>, i32 -> vector<16x128xf32>
    %c7 = arith.constant 7 : index
    %c0_62 = arith.constant 0 : index
    %108 = vector.load %arg2[%c7, %c0_62] : memref<17x128xf32, #tpu.memory_space<vmem>>, vector<1x128xf32>
    %109 = vector.broadcast %108 : vector<1x128xf32> to vector<16x128xf32>
    %110 = arith.mulf %107, %109 : vector<16x128xf32>
    %c114_i32 = arith.constant 114 : i32
    %111 = tpu.dynamic_rotate %95 by %c114_i32 dim 1 : vector<16x128xf32>, i32 -> vector<16x128xf32>
    %c8_63 = arith.constant 8 : index
    %c0_64 = arith.constant 0 : index
    %112 = vector.load %arg2[%c8_63, %c0_64] : memref<17x128xf32, #tpu.memory_space<vmem>>, vector<1x128xf32>
    %113 = vector.broadcast %112 : vector<1x128xf32> to vector<16x128xf32>
    %114 = arith.mulf %111, %113 : vector<16x128xf32>
    %c112_i32 = arith.constant 112 : i32
    %115 = tpu.dynamic_rotate %95 by %c112_i32 dim 1 : vector<16x128xf32>, i32 -> vector<16x128xf32>
    %c9 = arith.constant 9 : index
    %c0_65 = arith.constant 0 : index
    %116 = vector.load %arg2[%c9, %c0_65] : memref<17x128xf32, #tpu.memory_space<vmem>>, vector<1x128xf32>
    %117 = vector.broadcast %116 : vector<1x128xf32> to vector<16x128xf32>
    %118 = arith.mulf %115, %117 : vector<16x128xf32>
    %119 = tpu.concatenate %102, %106, %110, %95, %114, %118 in 0 : vector<16x128xf32>, vector<16x128xf32>, vector<16x128xf32>, vector<16x128xf32>, vector<16x128xf32>, vector<16x128xf32> -> vector<96x128xf32>
    %cst_66 = arith.constant dense<0.000000e+00> : vector<8x128xf32>
    %120 = tpu.matmul %96, %119, %cst_66 {dimension_numbers = #tpu.dot_dimension_numbers<[1], [0], [0], [1], [0, 0, 1, 1], [], []>} : vector<8x96xf32>, vector<96x128xf32>, vector<8x128xf32> -> vector<8x128xf32>
    %121 = vector.broadcast %98 : vector<8x1xf32> to vector<8x128xf32>
    %122 = arith.addf %120, %121 : vector<8x128xf32>
    %123 = vector.shape_cast %122 : vector<8x128xf32> to vector<1x8x128xf32>
    %cst_67 = arith.constant dense<0.000000e+00> : vector<1xf32>
    %124 = vector.multi_reduction <add>, %123, %cst_67 [1, 2] : vector<1x8x128xf32> to vector<1xf32>
    %125 = vector.shape_cast %124 : vector<1xf32> to vector<1x1x1xf32>
    %126 = vector.extract %125[0, 0, 0] : f32 from vector<1x1x1xf32>
    %cst_68 = arith.constant 1.024000e+03 : f32
    %127 = arith.divf %126, %cst_68 : f32
    %128 = vector.broadcast %127 : f32 to vector<8x128xf32>
    %129 = arith.subf %122, %128 : vector<8x128xf32>
    %130 = arith.mulf %129, %129 : vector<8x128xf32>
    %131 = vector.shape_cast %130 : vector<8x128xf32> to vector<1x8x128xf32>
    %cst_69 = arith.constant dense<0.000000e+00> : vector<1xf32>
    %132 = vector.multi_reduction <add>, %131, %cst_69 [1, 2] : vector<1x8x128xf32> to vector<1xf32>
    %133 = vector.shape_cast %132 : vector<1xf32> to vector<1x1x1xf32>
    %134 = vector.extract %133[0, 0, 0] : f32 from vector<1x1x1xf32>
    %cst_70 = arith.constant 1.024000e+03 : f32
    %135 = arith.divf %134, %cst_70 : f32
    %cst_71 = arith.constant 9.99999993E-9 : f32
    %136 = arith.addf %135, %cst_71 : f32
    %137 = math.rsqrt %136 : f32
    %c1_72 = arith.constant 1 : index
    %c0_73 = arith.constant 0 : index
    %c0_74 = arith.constant 0 : index
    %138 = vector.load %arg14[%c1_72, %c0_73, %c0_74] : memref<6x8x1xf32, #tpu.memory_space<vmem>>, vector<1x8x1xf32>
    %139 = vector.shape_cast %138 : vector<1x8x1xf32> to vector<8x1xf32>
    %140 = vector.broadcast %137 : f32 to vector<8x1xf32>
    %141 = arith.mulf %140, %139 : vector<8x1xf32>
    %142 = vector.broadcast %141 : vector<8x1xf32> to vector<8x128xf32>
    %143 = arith.mulf %129, %142 : vector<8x128xf32>
    %c1_75 = arith.constant 1 : index
    %c0_76 = arith.constant 0 : index
    %c0_77 = arith.constant 0 : index
    %144 = vector.load %arg15[%c1_75, %c0_76, %c0_77] : memref<6x8x1xf32, #tpu.memory_space<vmem>>, vector<1x8x1xf32>
    %145 = vector.shape_cast %144 : vector<1x8x1xf32> to vector<8x1xf32>
    %146 = vector.broadcast %145 : vector<8x1xf32> to vector<8x128xf32>
    %147 = arith.addf %143, %146 : vector<8x128xf32>
    %c2_78 = arith.constant 2 : index
    %148 = memref.load %arg16[%c2_78] : memref<8xf32, #tpu.memory_space<smem>>
    %cst_79 = arith.constant 0.000000e+00 : f32
    %149 = vector.broadcast %cst_79 : f32 to vector<8x128xf32>
    %150 = arith.cmpf oge, %147, %149 : vector<8x128xf32>
    %151 = vector.broadcast %148 : f32 to vector<8x128xf32>
    %152 = arith.mulf %151, %147 : vector<8x128xf32>
    %153 = arith.select %150, %147, %152 : vector<8x128xi1>, vector<8x128xf32>
    %c16 = arith.constant 16 : index
    %c0_80 = arith.constant 0 : index
    %154 = vector.load %arg18[%c16, %c0_80] : memref<48x128xf32, #tpu.memory_space<vmem>>, vector<8x128xf32>
    tpu.vector_store %arg18[%c16, %c0_80], %153 {strides = array<i32>} : memref<48x128xf32, #tpu.memory_space<vmem>>, vector<8x128xf32>,
    %c0_81 = arith.constant 0 : index
    %c0_82 = arith.constant 0 : index
    %155 = vector.load %arg18[%c0_81, %c0_82] : memref<48x128xf32, #tpu.memory_space<vmem>>, vector<24x128xf32>
    %c0_83 = arith.constant 0 : index
    %c0_84 = arith.constant 0 : index
    %156 = vector.load %arg9[%c0_83, %c0_84] : memref<8x144xf32, #tpu.memory_space<vmem>>, vector<8x144xf32>
    %c2_85 = arith.constant 2 : index
    %c0_86 = arith.constant 0 : index
    %c0_87 = arith.constant 0 : index
    %157 = vector.load %arg13[%c2_85, %c0_86, %c0_87] : memref<6x8x1xf32, #tpu.memory_space<vmem>>, vector<1x8x1xf32>
    %158 = vector.shape_cast %157 : vector<1x8x1xf32> to vector<8x1xf32>
    %c36_i32 = arith.constant 36 : i32
    %159 = tpu.dynamic_rotate %155 by %c36_i32 dim 1 : vector<24x128xf32>, i32 -> vector<24x128xf32>
    %c10 = arith.constant 10 : index
    %c0_88 = arith.constant 0 : index
    %160 = vector.load %arg2[%c10, %c0_88] : memref<17x128xf32, #tpu.memory_space<vmem>>, vector<1x128xf32>
    %161 = vector.broadcast %160 : vector<1x128xf32> to vector<24x128xf32>
    %162 = arith.mulf %159, %161 : vector<24x128xf32>
    %c32_i32 = arith.constant 32 : i32
    %163 = tpu.dynamic_rotate %155 by %c32_i32 dim 1 : vector<24x128xf32>, i32 -> vector<24x128xf32>
    %c11 = arith.constant 11 : index
    %c0_89 = arith.constant 0 : index
    %164 = vector.load %arg2[%c11, %c0_89] : memref<17x128xf32, #tpu.memory_space<vmem>>, vector<1x128xf32>
    %165 = vector.broadcast %164 : vector<1x128xf32> to vector<24x128xf32>
    %166 = arith.mulf %163, %165 : vector<24x128xf32>
    %c4_i32 = arith.constant 4 : i32
    %167 = tpu.dynamic_rotate %155 by %c4_i32 dim 1 : vector<24x128xf32>, i32 -> vector<24x128xf32>
    %c12 = arith.constant 12 : index
    %c0_90 = arith.constant 0 : index
    %168 = vector.load %arg2[%c12, %c0_90] : memref<17x128xf32, #tpu.memory_space<vmem>>, vector<1x128xf32>
    %169 = vector.broadcast %168 : vector<1x128xf32> to vector<24x128xf32>
    %170 = arith.mulf %167, %169 : vector<24x128xf32>
    %c100_i32 = arith.constant 100 : i32
    %171 = tpu.dynamic_rotate %155 by %c100_i32 dim 1 : vector<24x128xf32>, i32 -> vector<24x128xf32>
    %c13 = arith.constant 13 : index
    %c0_91 = arith.constant 0 : index
    %172 = vector.load %arg2[%c13, %c0_91] : memref<17x128xf32, #tpu.memory_space<vmem>>, vector<1x128xf32>
    %173 = vector.broadcast %172 : vector<1x128xf32> to vector<24x128xf32>
    %174 = arith.mulf %171, %173 : vector<24x128xf32>
    %c96_i32 = arith.constant 96 : i32
    %175 = tpu.dynamic_rotate %155 by %c96_i32 dim 1 : vector<24x128xf32>, i32 -> vector<24x128xf32>
    %c14 = arith.constant 14 : index
    %c0_92 = arith.constant 0 : index
    %176 = vector.load %arg2[%c14, %c0_92] : memref<17x128xf32, #tpu.memory_space<vmem>>, vector<1x128xf32>
    %177 = vector.broadcast %176 : vector<1x128xf32> to vector<24x128xf32>
    %178 = arith.mulf %175, %177 : vector<24x128xf32>
    %179 = tpu.concatenate %162, %166, %170, %155, %174, %178 in 0 : vector<24x128xf32>, vector<24x128xf32>, vector<24x128xf32>, vector<24x128xf32>, vector<24x128xf32>, vector<24x128xf32> -> vector<144x128xf32>
    %cst_93 = arith.constant dense<0.000000e+00> : vector<8x128xf32>
    %180 = tpu.matmul %156, %179, %cst_93 {dimension_numbers = #tpu.dot_dimension_numbers<[1], [0], [0], [1], [0, 0, 1, 1], [], []>} : vector<8x144xf32>, vector<144x128xf32>, vector<8x128xf32> -> vector<8x128xf32>
    %181 = vector.broadcast %158 : vector<8x1xf32> to vector<8x128xf32>
    %182 = arith.addf %180, %181 : vector<8x128xf32>
    %183 = vector.shape_cast %182 : vector<8x128xf32> to vector<1x8x128xf32>
    %cst_94 = arith.constant dense<0.000000e+00> : vector<1xf32>
    %184 = vector.multi_reduction <add>, %183, %cst_94 [1, 2] : vector<1x8x128xf32> to vector<1xf32>
    %185 = vector.shape_cast %184 : vector<1xf32> to vector<1x1x1xf32>
    %186 = vector.extract %185[0, 0, 0] : f32 from vector<1x1x1xf32>
    %cst_95 = arith.constant 1.024000e+03 : f32
    %187 = arith.divf %186, %cst_95 : f32
    %188 = vector.broadcast %187 : f32 to vector<8x128xf32>
    %189 = arith.subf %182, %188 : vector<8x128xf32>
    %190 = arith.mulf %189, %189 : vector<8x128xf32>
    %191 = vector.shape_cast %190 : vector<8x128xf32> to vector<1x8x128xf32>
    %cst_96 = arith.constant dense<0.000000e+00> : vector<1xf32>
    %192 = vector.multi_reduction <add>, %191, %cst_96 [1, 2] : vector<1x8x128xf32> to vector<1xf32>
    %193 = vector.shape_cast %192 : vector<1xf32> to vector<1x1x1xf32>
    %194 = vector.extract %193[0, 0, 0] : f32 from vector<1x1x1xf32>
    %cst_97 = arith.constant 1.024000e+03 : f32
    %195 = arith.divf %194, %cst_97 : f32
    %cst_98 = arith.constant 9.99999993E-9 : f32
    %196 = arith.addf %195, %cst_98 : f32
    %197 = math.rsqrt %196 : f32
    %c2_99 = arith.constant 2 : index
    %c0_100 = arith.constant 0 : index
    %c0_101 = arith.constant 0 : index
    %198 = vector.load %arg14[%c2_99, %c0_100, %c0_101] : memref<6x8x1xf32, #tpu.memory_space<vmem>>, vector<1x8x1xf32>
    %199 = vector.shape_cast %198 : vector<1x8x1xf32> to vector<8x1xf32>
    %200 = vector.broadcast %197 : f32 to vector<8x1xf32>
    %201 = arith.mulf %200, %199 : vector<8x1xf32>
    %202 = vector.broadcast %201 : vector<8x1xf32> to vector<8x128xf32>
    %203 = arith.mulf %189, %202 : vector<8x128xf32>
    %c2_102 = arith.constant 2 : index
    %c0_103 = arith.constant 0 : index
    %c0_104 = arith.constant 0 : index
    %204 = vector.load %arg15[%c2_102, %c0_103, %c0_104] : memref<6x8x1xf32, #tpu.memory_space<vmem>>, vector<1x8x1xf32>
    %205 = vector.shape_cast %204 : vector<1x8x1xf32> to vector<8x1xf32>
    %206 = vector.broadcast %205 : vector<8x1xf32> to vector<8x128xf32>
    %207 = arith.addf %203, %206 : vector<8x128xf32>
    %c3_105 = arith.constant 3 : index
    %208 = memref.load %arg16[%c3_105] : memref<8xf32, #tpu.memory_space<smem>>
    %cst_106 = arith.constant 0.000000e+00 : f32
    %209 = vector.broadcast %cst_106 : f32 to vector<8x128xf32>
    %210 = arith.cmpf oge, %207, %209 : vector<8x128xf32>
    %211 = vector.broadcast %208 : f32 to vector<8x128xf32>
    %212 = arith.mulf %211, %207 : vector<8x128xf32>
    %213 = arith.select %210, %207, %212 : vector<8x128xi1>, vector<8x128xf32>
    %c24 = arith.constant 24 : index
    %c0_107 = arith.constant 0 : index
    %214 = vector.load %arg18[%c24, %c0_107] : memref<48x128xf32, #tpu.memory_space<vmem>>, vector<8x128xf32>
    tpu.vector_store %arg18[%c24, %c0_107], %213 {strides = array<i32>} : memref<48x128xf32, #tpu.memory_space<vmem>>, vector<8x128xf32>,
    %c0_108 = arith.constant 0 : index
    %c0_109 = arith.constant 0 : index
    %215 = vector.load %arg18[%c0_108, %c0_109] : memref<48x128xf32, #tpu.memory_space<vmem>>, vector<32x128xf32>
    %c0_110 = arith.constant 0 : index
    %c0_111 = arith.constant 0 : index
    %216 = vector.load %arg10[%c0_110, %c0_111] : memref<8x96xf32, #tpu.memory_space<vmem>>, vector<8x96xf32>
    %c3_112 = arith.constant 3 : index
    %c0_113 = arith.constant 0 : index
    %c0_114 = arith.constant 0 : index
    %217 = vector.load %arg13[%c3_112, %c0_113, %c0_114] : memref<6x8x1xf32, #tpu.memory_space<vmem>>, vector<1x8x1xf32>
    %218 = vector.shape_cast %217 : vector<1x8x1xf32> to vector<8x1xf32>
    %c64_i32 = arith.constant 64 : i32
    %219 = tpu.dynamic_rotate %215 by %c64_i32 dim 1 : vector<32x128xf32>, i32 -> vector<32x128xf32>
    %c15 = arith.constant 15 : index
    %c0_115 = arith.constant 0 : index
    %220 = vector.load %arg2[%c15, %c0_115] : memref<17x128xf32, #tpu.memory_space<vmem>>, vector<1x128xf32>
    %221 = vector.broadcast %220 : vector<1x128xf32> to vector<32x128xf32>
    %222 = arith.mulf %219, %221 : vector<32x128xf32>
    %c64_i32_116 = arith.constant 64 : i32
    %223 = tpu.dynamic_rotate %215 by %c64_i32_116 dim 1 : vector<32x128xf32>, i32 -> vector<32x128xf32>
    %c16_117 = arith.constant 16 : index
    %c0_118 = arith.constant 0 : index
    %224 = vector.load %arg2[%c16_117, %c0_118] : memref<17x128xf32, #tpu.memory_space<vmem>>, vector<1x128xf32>
    %225 = vector.broadcast %224 : vector<1x128xf32> to vector<32x128xf32>
    %226 = arith.mulf %223, %225 : vector<32x128xf32>
    %227 = tpu.concatenate %222, %215, %226 in 0 : vector<32x128xf32>, vector<32x128xf32>, vector<32x128xf32> -> vector<96x128xf32>
    %cst_119 = arith.constant dense<0.000000e+00> : vector<8x128xf32>
    %228 = tpu.matmul %216, %227, %cst_119 {dimension_numbers = #tpu.dot_dimension_numbers<[1], [0], [0], [1], [0, 0, 1, 1], [], []>} : vector<8x96xf32>, vector<96x128xf32>, vector<8x128xf32> -> vector<8x128xf32>
    %229 = vector.broadcast %218 : vector<8x1xf32> to vector<8x128xf32>
    %230 = arith.addf %228, %229 : vector<8x128xf32>
    %231 = vector.shape_cast %230 : vector<8x128xf32> to vector<1x8x128xf32>
    %cst_120 = arith.constant dense<0.000000e+00> : vector<1xf32>
    %232 = vector.multi_reduction <add>, %231, %cst_120 [1, 2] : vector<1x8x128xf32> to vector<1xf32>
    %233 = vector.shape_cast %232 : vector<1xf32> to vector<1x1x1xf32>
    %234 = vector.extract %233[0, 0, 0] : f32 from vector<1x1x1xf32>
    %cst_121 = arith.constant 1.024000e+03 : f32
    %235 = arith.divf %234, %cst_121 : f32
    %236 = vector.broadcast %235 : f32 to vector<8x128xf32>
    %237 = arith.subf %230, %236 : vector<8x128xf32>
    %238 = arith.mulf %237, %237 : vector<8x128xf32>
    %239 = vector.shape_cast %238 : vector<8x128xf32> to vector<1x8x128xf32>
    %cst_122 = arith.constant dense<0.000000e+00> : vector<1xf32>
    %240 = vector.multi_reduction <add>, %239, %cst_122 [1, 2] : vector<1x8x128xf32> to vector<1xf32>
    %241 = vector.shape_cast %240 : vector<1xf32> to vector<1x1x1xf32>
    %242 = vector.extract %241[0, 0, 0] : f32 from vector<1x1x1xf32>
    %cst_123 = arith.constant 1.024000e+03 : f32
    %243 = arith.divf %242, %cst_123 : f32
    %cst_124 = arith.constant 9.99999993E-9 : f32
    %244 = arith.addf %243, %cst_124 : f32
    %245 = math.rsqrt %244 : f32
    %c3_125 = arith.constant 3 : index
    %c0_126 = arith.constant 0 : index
    %c0_127 = arith.constant 0 : index
    %246 = vector.load %arg14[%c3_125, %c0_126, %c0_127] : memref<6x8x1xf32, #tpu.memory_space<vmem>>, vector<1x8x1xf32>
    %247 = vector.shape_cast %246 : vector<1x8x1xf32> to vector<8x1xf32>
    %248 = vector.broadcast %245 : f32 to vector<8x1xf32>
    %249 = arith.mulf %248, %247 : vector<8x1xf32>
    %250 = vector.broadcast %249 : vector<8x1xf32> to vector<8x128xf32>
    %251 = arith.mulf %237, %250 : vector<8x128xf32>
    %c3_128 = arith.constant 3 : index
    %c0_129 = arith.constant 0 : index
    %c0_130 = arith.constant 0 : index
    %252 = vector.load %arg15[%c3_128, %c0_129, %c0_130] : memref<6x8x1xf32, #tpu.memory_space<vmem>>, vector<1x8x1xf32>
    %253 = vector.shape_cast %252 : vector<1x8x1xf32> to vector<8x1xf32>
    %254 = vector.broadcast %253 : vector<8x1xf32> to vector<8x128xf32>
    %255 = arith.addf %251, %254 : vector<8x128xf32>
    %c4_131 = arith.constant 4 : index
    %256 = memref.load %arg16[%c4_131] : memref<8xf32, #tpu.memory_space<smem>>
    %cst_132 = arith.constant 0.000000e+00 : f32
    %257 = vector.broadcast %cst_132 : f32 to vector<8x128xf32>
    %258 = arith.cmpf oge, %255, %257 : vector<8x128xf32>
    %259 = vector.broadcast %256 : f32 to vector<8x128xf32>
    %260 = arith.mulf %259, %255 : vector<8x128xf32>
    %261 = arith.select %258, %255, %260 : vector<8x128xi1>, vector<8x128xf32>
    %c32 = arith.constant 32 : index
    %c0_133 = arith.constant 0 : index
    %262 = vector.load %arg18[%c32, %c0_133] : memref<48x128xf32, #tpu.memory_space<vmem>>, vector<8x128xf32>
    tpu.vector_store %arg18[%c32, %c0_133], %261 {strides = array<i32>} : memref<48x128xf32, #tpu.memory_space<vmem>>, vector<8x128xf32>,
    %c0_134 = arith.constant 0 : index
    %c0_135 = arith.constant 0 : index
    %263 = vector.load %arg18[%c0_134, %c0_135] : memref<48x128xf32, #tpu.memory_space<vmem>>, vector<40x128xf32>
    %c0_136 = arith.constant 0 : index
    %c0_137 = arith.constant 0 : index
    %264 = vector.load %arg11[%c0_136, %c0_137] : memref<8x40xf32, #tpu.memory_space<vmem>>, vector<8x40xf32>
    %c4_138 = arith.constant 4 : index
    %c0_139 = arith.constant 0 : index
    %c0_140 = arith.constant 0 : index
    %265 = vector.load %arg13[%c4_138, %c0_139, %c0_140] : memref<6x8x1xf32, #tpu.memory_space<vmem>>, vector<1x8x1xf32>
    %266 = vector.shape_cast %265 : vector<1x8x1xf32> to vector<8x1xf32>
    %cst_141 = arith.constant dense<0.000000e+00> : vector<8x128xf32>
    %267 = tpu.matmul %264, %263, %cst_141 {dimension_numbers = #tpu.dot_dimension_numbers<[1], [0], [0], [1], [0, 0, 1, 1], [], []>} : vector<8x40xf32>, vector<40x128xf32>, vector<8x128xf32> -> vector<8x128xf32>
    %268 = vector.broadcast %266 : vector<8x1xf32> to vector<8x128xf32>
    %269 = arith.addf %267, %268 : vector<8x128xf32>
    %270 = vector.shape_cast %269 : vector<8x128xf32> to vector<1x8x128xf32>
    %cst_142 = arith.constant dense<0.000000e+00> : vector<1xf32>
    %271 = vector.multi_reduction <add>, %270, %cst_142 [1, 2] : vector<1x8x128xf32> to vector<1xf32>
    %272 = vector.shape_cast %271 : vector<1xf32> to vector<1x1x1xf32>
    %273 = vector.extract %272[0, 0, 0] : f32 from vector<1x1x1xf32>
    %cst_143 = arith.constant 1.024000e+03 : f32
    %274 = arith.divf %273, %cst_143 : f32
    %275 = vector.broadcast %274 : f32 to vector<8x128xf32>
    %276 = arith.subf %269, %275 : vector<8x128xf32>
    %277 = arith.mulf %276, %276 : vector<8x128xf32>
    %278 = vector.shape_cast %277 : vector<8x128xf32> to vector<1x8x128xf32>
    %cst_144 = arith.constant dense<0.000000e+00> : vector<1xf32>
    %279 = vector.multi_reduction <add>, %278, %cst_144 [1, 2] : vector<1x8x128xf32> to vector<1xf32>
    %280 = vector.shape_cast %279 : vector<1xf32> to vector<1x1x1xf32>
    %281 = vector.extract %280[0, 0, 0] : f32 from vector<1x1x1xf32>
    %cst_145 = arith.constant 1.024000e+03 : f32
    %282 = arith.divf %281, %cst_145 : f32
    %cst_146 = arith.constant 9.99999993E-9 : f32
    %283 = arith.addf %282, %cst_146 : f32
    %284 = math.rsqrt %283 : f32
    %c4_147 = arith.constant 4 : index
    %c0_148 = arith.constant 0 : index
    %c0_149 = arith.constant 0 : index
    %285 = vector.load %arg14[%c4_147, %c0_148, %c0_149] : memref<6x8x1xf32, #tpu.memory_space<vmem>>, vector<1x8x1xf32>
    %286 = vector.shape_cast %285 : vector<1x8x1xf32> to vector<8x1xf32>
    %287 = vector.broadcast %284 : f32 to vector<8x1xf32>
    %288 = arith.mulf %287, %286 : vector<8x1xf32>
    %289 = vector.broadcast %288 : vector<8x1xf32> to vector<8x128xf32>
    %290 = arith.mulf %276, %289 : vector<8x128xf32>
    %c4_150 = arith.constant 4 : index
    %c0_151 = arith.constant 0 : index
    %c0_152 = arith.constant 0 : index
    %291 = vector.load %arg15[%c4_150, %c0_151, %c0_152] : memref<6x8x1xf32, #tpu.memory_space<vmem>>, vector<1x8x1xf32>
    %292 = vector.shape_cast %291 : vector<1x8x1xf32> to vector<8x1xf32>
    %293 = vector.broadcast %292 : vector<8x1xf32> to vector<8x128xf32>
    %294 = arith.addf %290, %293 : vector<8x128xf32>
    %c5_153 = arith.constant 5 : index
    %295 = memref.load %arg16[%c5_153] : memref<8xf32, #tpu.memory_space<smem>>
    %cst_154 = arith.constant 0.000000e+00 : f32
    %296 = vector.broadcast %cst_154 : f32 to vector<8x128xf32>
    %297 = arith.cmpf oge, %294, %296 : vector<8x128xf32>
    %298 = vector.broadcast %295 : f32 to vector<8x128xf32>
    %299 = arith.mulf %298, %294 : vector<8x128xf32>
    %300 = arith.select %297, %294, %299 : vector<8x128xi1>, vector<8x128xf32>
    %c40 = arith.constant 40 : index
    %c0_155 = arith.constant 0 : index
    %301 = vector.load %arg18[%c40, %c0_155] : memref<48x128xf32, #tpu.memory_space<vmem>>, vector<8x128xf32>
    tpu.vector_store %arg18[%c40, %c0_155], %300 {strides = array<i32>} : memref<48x128xf32, #tpu.memory_space<vmem>>, vector<8x128xf32>,
    %c0_156 = arith.constant 0 : index
    %c0_157 = arith.constant 0 : index
    %302 = vector.load %arg18[%c0_156, %c0_157] : memref<48x128xf32, #tpu.memory_space<vmem>>, vector<48x128xf32>
    %c0_158 = arith.constant 0 : index
    %c0_159 = arith.constant 0 : index
    %303 = vector.load %arg12[%c0_158, %c0_159] : memref<8x48xf32, #tpu.memory_space<vmem>>, vector<8x48xf32>
    %c5_160 = arith.constant 5 : index
    %c0_161 = arith.constant 0 : index
    %c0_162 = arith.constant 0 : index
    %304 = vector.load %arg13[%c5_160, %c0_161, %c0_162] : memref<6x8x1xf32, #tpu.memory_space<vmem>>, vector<1x8x1xf32>
    %305 = vector.shape_cast %304 : vector<1x8x1xf32> to vector<8x1xf32>
    %cst_163 = arith.constant dense<0.000000e+00> : vector<8x128xf32>
    %306 = tpu.matmul %303, %302, %cst_163 {dimension_numbers = #tpu.dot_dimension_numbers<[1], [0], [0], [1], [0, 0, 1, 1], [], []>} : vector<8x48xf32>, vector<48x128xf32>, vector<8x128xf32> -> vector<8x128xf32>
    %307 = vector.broadcast %305 : vector<8x1xf32> to vector<8x128xf32>
    %308 = arith.addf %306, %307 : vector<8x128xf32>
    %309 = vector.shape_cast %308 : vector<8x128xf32> to vector<1x8x128xf32>
    %cst_164 = arith.constant dense<0.000000e+00> : vector<1xf32>
    %310 = vector.multi_reduction <add>, %309, %cst_164 [1, 2] : vector<1x8x128xf32> to vector<1xf32>
    %311 = vector.shape_cast %310 : vector<1xf32> to vector<1x1x1xf32>
    %312 = vector.extract %311[0, 0, 0] : f32 from vector<1x1x1xf32>
    %cst_165 = arith.constant 1.024000e+03 : f32
    %313 = arith.divf %312, %cst_165 : f32
    %314 = vector.broadcast %313 : f32 to vector<8x128xf32>
    %315 = arith.subf %308, %314 : vector<8x128xf32>
    %316 = arith.mulf %315, %315 : vector<8x128xf32>
    %317 = vector.shape_cast %316 : vector<8x128xf32> to vector<1x8x128xf32>
    %cst_166 = arith.constant dense<0.000000e+00> : vector<1xf32>
    %318 = vector.multi_reduction <add>, %317, %cst_166 [1, 2] : vector<1x8x128xf32> to vector<1xf32>
    %319 = vector.shape_cast %318 : vector<1xf32> to vector<1x1x1xf32>
    %320 = vector.extract %319[0, 0, 0] : f32 from vector<1x1x1xf32>
    %cst_167 = arith.constant 1.024000e+03 : f32
    %321 = arith.divf %320, %cst_167 : f32
    %cst_168 = arith.constant 9.99999993E-9 : f32
    %322 = arith.addf %321, %cst_168 : f32
    %323 = math.rsqrt %322 : f32
    %c5_169 = arith.constant 5 : index
    %c0_170 = arith.constant 0 : index
    %c0_171 = arith.constant 0 : index
    %324 = vector.load %arg14[%c5_169, %c0_170, %c0_171] : memref<6x8x1xf32, #tpu.memory_space<vmem>>, vector<1x8x1xf32>
    %325 = vector.shape_cast %324 : vector<1x8x1xf32> to vector<8x1xf32>
    %326 = vector.broadcast %323 : f32 to vector<8x1xf32>
    %327 = arith.mulf %326, %325 : vector<8x1xf32>
    %328 = vector.broadcast %327 : vector<8x1xf32> to vector<8x128xf32>
    %329 = arith.mulf %315, %328 : vector<8x128xf32>
    %c5_172 = arith.constant 5 : index
    %c0_173 = arith.constant 0 : index
    %c0_174 = arith.constant 0 : index
    %330 = vector.load %arg15[%c5_172, %c0_173, %c0_174] : memref<6x8x1xf32, #tpu.memory_space<vmem>>, vector<1x8x1xf32>
    %331 = vector.shape_cast %330 : vector<1x8x1xf32> to vector<8x1xf32>
    %332 = vector.broadcast %331 : vector<8x1xf32> to vector<8x128xf32>
    %333 = arith.addf %329, %332 : vector<8x128xf32>
    %c6_175 = arith.constant 6 : index
    %334 = memref.load %arg16[%c6_175] : memref<8xf32, #tpu.memory_space<smem>>
    %cst_176 = arith.constant 0.000000e+00 : f32
    %335 = vector.broadcast %cst_176 : f32 to vector<8x128xf32>
    %336 = arith.cmpf oge, %333, %335 : vector<8x128xf32>
    %337 = vector.broadcast %334 : f32 to vector<8x128xf32>
    %338 = arith.mulf %337, %333 : vector<8x128xf32>
    %339 = arith.select %336, %333, %338 : vector<8x128xi1>, vector<8x128xf32>
    %c0_177 = arith.constant 0 : index
    %c0_178 = arith.constant 0 : index
    %340 = vector.load %arg5[%c0_177, %c0_178] : memref<16x48xf32, #tpu.memory_space<vmem>>, vector<16x48xf32>
    %c0_179 = arith.constant 0 : index
    %c0_180 = arith.constant 0 : index
    %341 = vector.load %arg6[%c0_179, %c0_180] : memref<16x1xf32, #tpu.memory_space<vmem>>, vector<16x1xf32>
    %c9_i32_181 = arith.constant 9 : i32
    %342 = tpu.dynamic_rotate %339 by %c9_i32_181 dim 1 : vector<8x128xf32>, i32 -> vector<8x128xf32>
    %c0_182 = arith.constant 0 : index
    %c0_183 = arith.constant 0 : index
    %343 = vector.load %arg2[%c0_182, %c0_183] : memref<17x128xf32, #tpu.memory_space<vmem>>, vector<1x128xf32>
    %344 = vector.broadcast %343 : vector<1x128xf32> to vector<8x128xf32>
    %345 = arith.mulf %342, %344 : vector<8x128xf32>
    %c8_i32_184 = arith.constant 8 : i32
    %346 = tpu.dynamic_rotate %339 by %c8_i32_184 dim 1 : vector<8x128xf32>, i32 -> vector<8x128xf32>
    %c1_185 = arith.constant 1 : index
    %c0_186 = arith.constant 0 : index
    %347 = vector.load %arg2[%c1_185, %c0_186] : memref<17x128xf32, #tpu.memory_space<vmem>>, vector<1x128xf32>
    %348 = vector.broadcast %347 : vector<1x128xf32> to vector<8x128xf32>
    %349 = arith.mulf %346, %348 : vector<8x128xf32>
    %c1_i32_187 = arith.constant 1 : i32
    %350 = tpu.dynamic_rotate %339 by %c1_i32_187 dim 1 : vector<8x128xf32>, i32 -> vector<8x128xf32>
    %c2_188 = arith.constant 2 : index
    %c0_189 = arith.constant 0 : index
    %351 = vector.load %arg2[%c2_188, %c0_189] : memref<17x128xf32, #tpu.memory_space<vmem>>, vector<1x128xf32>
    %352 = vector.broadcast %351 : vector<1x128xf32> to vector<8x128xf32>
    %353 = arith.mulf %350, %352 : vector<8x128xf32>
    %c121_i32_190 = arith.constant 121 : i32
    %354 = tpu.dynamic_rotate %339 by %c121_i32_190 dim 1 : vector<8x128xf32>, i32 -> vector<8x128xf32>
    %c3_191 = arith.constant 3 : index
    %c0_192 = arith.constant 0 : index
    %355 = vector.load %arg2[%c3_191, %c0_192] : memref<17x128xf32, #tpu.memory_space<vmem>>, vector<1x128xf32>
    %356 = vector.broadcast %355 : vector<1x128xf32> to vector<8x128xf32>
    %357 = arith.mulf %354, %356 : vector<8x128xf32>
    %c120_i32_193 = arith.constant 120 : i32
    %358 = tpu.dynamic_rotate %339 by %c120_i32_193 dim 1 : vector<8x128xf32>, i32 -> vector<8x128xf32>
    %c4_194 = arith.constant 4 : index
    %c0_195 = arith.constant 0 : index
    %359 = vector.load %arg2[%c4_194, %c0_195] : memref<17x128xf32, #tpu.memory_space<vmem>>, vector<1x128xf32>
    %360 = vector.broadcast %359 : vector<1x128xf32> to vector<8x128xf32>
    %361 = arith.mulf %358, %360 : vector<8x128xf32>
    %362 = tpu.concatenate %345, %349, %353, %339, %357, %361 in 0 : vector<8x128xf32>, vector<8x128xf32>, vector<8x128xf32>, vector<8x128xf32>, vector<8x128xf32>, vector<8x128xf32> -> vector<48x128xf32>
    %cst_196 = arith.constant dense<0.000000e+00> : vector<16x128xf32>
    %363 = tpu.matmul %340, %362, %cst_196 {dimension_numbers = #tpu.dot_dimension_numbers<[1], [0], [0], [1], [0, 0, 1, 1], [], []>} : vector<16x48xf32>, vector<48x128xf32>, vector<16x128xf32> -> vector<16x128xf32>
    %364 = vector.broadcast %341 : vector<16x1xf32> to vector<16x128xf32>
    %365 = arith.addf %363, %364 : vector<16x128xf32>
    %c7_197 = arith.constant 7 : index
    %366 = memref.load %arg16[%c7_197] : memref<8xf32, #tpu.memory_space<smem>>
    %cst_198 = arith.constant 0.000000e+00 : f32
    %367 = vector.broadcast %cst_198 : f32 to vector<16x128xf32>
    %368 = arith.cmpf oge, %365, %367 : vector<16x128xf32>
    %369 = vector.broadcast %366 : f32 to vector<16x128xf32>
    %370 = arith.mulf %369, %365 : vector<16x128xf32>
    %371 = arith.select %368, %365, %370 : vector<16x128xi1>, vector<16x128xf32>
    %c0_199 = arith.constant 0 : index
    %c0_200 = arith.constant 0 : index
    %c0_201 = arith.constant 0 : index
    %372 = vector.load %arg17[%c0_199, %c0_200, %c0_201] : memref<1x16x128xf32, #tpu.memory_space<vmem>>, vector<1x16x128xf32>
    %373 = vector.shape_cast %372 : vector<1x16x128xf32> to vector<16x128xf32>
    %374 = vector.shape_cast %371 : vector<16x128xf32> to vector<1x16x128xf32>
    tpu.vector_store %arg17[%c0_199, %c0_200, %c0_201], %374 {strides = array<i32>} : memref<1x16x128xf32, #tpu.memory_space<vmem>>, vector<1x16x128xf32>,
    return
  }
  func.func @transform_0(%arg0: i32) -> (i32, i32, i32) {
    %c0_i32 = arith.constant 0 : i32
    %c0_i32_0 = arith.constant 0 : i32
    %c0_i32_1 = arith.constant 0 : i32
    return %arg0, %c0_i32, %c0_i32_0 : i32, i32, i32
  }
  func.func @transform_1(%arg0: i32) -> (i32, i32) {
    %c0_i32 = arith.constant 0 : i32
    %c0_i32_0 = arith.constant 0 : i32
    %c0_i32_1 = arith.constant 0 : i32
    return %c0_i32, %c0_i32_0 : i32, i32
  }
  func.func @transform_2(%arg0: i32) -> (i32, i32) {
    %c0_i32 = arith.constant 0 : i32
    %c0_i32_0 = arith.constant 0 : i32
    %c0_i32_1 = arith.constant 0 : i32
    return %c0_i32, %c0_i32_0 : i32, i32
  }
  func.func @transform_3(%arg0: i32) -> (i32, i32) {
    %c0_i32 = arith.constant 0 : i32
    %c0_i32_0 = arith.constant 0 : i32
    %c0_i32_1 = arith.constant 0 : i32
    return %c0_i32, %c0_i32_0 : i32, i32
  }
  func.func @transform_4(%arg0: i32) -> (i32, i32) {
    %c0_i32 = arith.constant 0 : i32
    %c0_i32_0 = arith.constant 0 : i32
    %c0_i32_1 = arith.constant 0 : i32
    return %c0_i32, %c0_i32_0 : i32, i32
  }
  func.func @transform_5(%arg0: i32) -> (i32, i32) {
    %c0_i32 = arith.constant 0 : i32
    %c0_i32_0 = arith.constant 0 : i32
    %c0_i32_1 = arith.constant 0 : i32
    return %c0_i32, %c0_i32_0 : i32, i32
  }
  func.func @transform_6(%arg0: i32) -> (i32, i32) {
    %c0_i32 = arith.constant 0 : i32
    %c0_i32_0 = arith.constant 0 : i32
    %c0_i32_1 = arith.constant 0 : i32
    return %c0_i32, %c0_i32_0 : i32, i32
  }
  func.func @transform_7(%arg0: i32) -> (i32, i32) {
    %c0_i32 = arith.constant 0 : i32
    %c0_i32_0 = arith.constant 0 : i32
    %c0_i32_1 = arith.constant 0 : i32
    return %c0_i32, %c0_i32_0 : i32, i32
  }
  func.func @transform_8(%arg0: i32) -> (i32, i32) {
    %c0_i32 = arith.constant 0 : i32
    %c0_i32_0 = arith.constant 0 : i32
    %c0_i32_1 = arith.constant 0 : i32
    return %c0_i32, %c0_i32_0 : i32, i32
  }
  func.func @transform_9(%arg0: i32) -> (i32, i32) {
    %c0_i32 = arith.constant 0 : i32
    %c0_i32_0 = arith.constant 0 : i32
    %c0_i32_1 = arith.constant 0 : i32
    return %c0_i32, %c0_i32_0 : i32, i32
  }
  func.func @transform_10(%arg0: i32) -> (i32, i32) {
    %c0_i32 = arith.constant 0 : i32
    %c0_i32_0 = arith.constant 0 : i32
    %c0_i32_1 = arith.constant 0 : i32
    return %c0_i32, %c0_i32_0 : i32, i32
  }
  func.func @transform_11(%arg0: i32) -> (i32, i32) {
    %c0_i32 = arith.constant 0 : i32
    %c0_i32_0 = arith.constant 0 : i32
    %c0_i32_1 = arith.constant 0 : i32
    return %c0_i32, %c0_i32_0 : i32, i32
  }
  func.func @transform_12(%arg0: i32) -> (i32, i32, i32) {
    %c0_i32 = arith.constant 0 : i32
    %c0_i32_0 = arith.constant 0 : i32
    %c0_i32_1 = arith.constant 0 : i32
    %c0_i32_2 = arith.constant 0 : i32
    return %c0_i32, %c0_i32_0, %c0_i32_1 : i32, i32, i32
  }
  func.func @transform_13(%arg0: i32) -> (i32, i32, i32) {
    %c0_i32 = arith.constant 0 : i32
    %c0_i32_0 = arith.constant 0 : i32
    %c0_i32_1 = arith.constant 0 : i32
    %c0_i32_2 = arith.constant 0 : i32
    return %c0_i32, %c0_i32_0, %c0_i32_1 : i32, i32, i32
  }
  func.func @transform_14(%arg0: i32) -> (i32, i32, i32) {
    %c0_i32 = arith.constant 0 : i32
    %c0_i32_0 = arith.constant 0 : i32
    %c0_i32_1 = arith.constant 0 : i32
    %c0_i32_2 = arith.constant 0 : i32
    return %c0_i32, %c0_i32_0, %c0_i32_1 : i32, i32, i32
  }
  func.func @transform_15(%arg0: i32) -> i32 {
    %c0_i32 = arith.constant 0 : i32
    %c0_i32_0 = arith.constant 0 : i32
    return %c0_i32 : i32
  }
  func.func @transform_16(%arg0: i32) -> (i32, i32, i32) {
    %c0_i32 = arith.constant 0 : i32
    %c0_i32_0 = arith.constant 0 : i32
    %c0_i32_1 = arith.constant 0 : i32
    return %arg0, %c0_i32, %c0_i32_0 : i32, i32, i32
  }
}

</mosaic_0001>

<bundles_post_ra>
// kernel: dilated_dense_block.1
= control target key start
LH: loop header
LB: loop body
LE: loop exit
PB: predicated region body
PF: predicated region fallthrough
CT: control target
= control target key end

     0   :  { %s2821_s0 = inlined_call_operand.vmem [shape: f32[2,16,128], index: 0, kind: input, shape index: {}]   ;;  %s2822_s1 = inlined_call_operand.vmem [shape: f32[17,128], index: 1, kind: input, shape index: {}]   ;;  %s2823_s2 = inlined_call_operand.vmem [shape: f32[8,96], index: 2, kind: input, shape index: {}]   ;;  %s2824_s3 = inlined_call_operand.vmem [shape: f32[8,1], index: 3, kind: input, shape index: {}]   ;;  %s2825_s4 = inlined_call_operand.vmem [shape: f32[16,48], index: 4, kind: input, shape index: {}]   ;;  %s2826_s5 = inlined_call_operand.vmem [shape: f32[16,1], index: 5, kind: input, shape index: {}]   ;;  %s2827_s6 = inlined_call_operand.vmem [shape: f32[8,48], index: 6, kind: input, shape index: {}]   ;;  %s2828_s7 = inlined_call_operand.vmem [shape: f32[8,96], index: 7, kind: input, shape index: {}]   ;;  %s2829_s8 = inlined_call_operand.vmem [shape: f32[8,144], index: 8, kind: input, shape index: {}]   ;;  %s2830_s9 = inlined_call_operand.vmem [shape: f32[8,96], index: 9, kind: input, shape index: {}]   ;;  %s2831_s10 = inlined_call_operand.vmem [shape: f32[8,40], index: 10, kind: input, shape index: {}]   ;;  %s2832_s11 = inlined_call_operand.vmem [shape: f32[8,48], index: 11, kind: input, shape index: {}]   ;;  %s2833_s12 = inlined_call_operand.vmem [shape: f32[6,8,1], index: 12, kind: input, shape index: {}]   ;;  %s2834_s13 = inlined_call_operand.vmem [shape: f32[6,8,1], index: 13, kind: input, shape index: {}]   ;;  %s2835_s14 = inlined_call_operand.vmem [shape: f32[6,8,1], index: 14, kind: input, shape index: {}]   ;;  %s2836_s15 = inlined_call_operand.vmem [shape: f32[8], index: 15, kind: input, shape index: {}]   ;;  %s2837_s16 = inlined_call_operand.vmem [shape: f32[2,16,128], index: 16, kind: output, shape index: {}]  }
   0x1   :  { %2843 = sst [smem:[#allocation6_spill]] %s2821_s0 }
   0x2   :  { %21 = vsyncpa [#allocation4], 0  ;;  %s2419_s21 = smov 0  }
   0x3 LB: > { %s1920_s22 = sadd.s32 4294967295, %s2312_s21   ;;  %p1922_p0 = scmp.ge.s32.totalorder %s2312_s21, 1  ;;  %s2312_s21 = sphi %s2419_s21, %s27_s21  }
   0x4   : > { %p399_p1 = scmp.lt.s32.totalorder %s2312_s21, 3  ;;  %s454_s25 = sshll.u32 %s2836_s15, 4  ;;  %s455_s25 = int_to_ptr.vmem [resolvable:$true] %s454_s25 }
   0x5   : > { %p2243_p3 = scmp.eq.s32.totalorder %s1920_s22, 0  ;;  %s2287_s27 = scalar_lea.vmem %s455_s25, 16 }
   0x6   : > { %p2430_p2 = pnand %p1922_p0, %p399_p1  ;;  %p2288_p6 = scmp.ne.s32.totalorder %s455_s25, %s2287_s27 }
   0x7   : > { %p2295_p10 = scmp.lt.s32.totalorder %s455_s25, %s455_s25  ;;  %p2296_p11 = scmp.lt.s32.totalorder %s2287_s27, %s2287_s27 }
   0x8   : > { %p2239_p4 = pneg %p2430_p2 }
   0x9   : > { %p2297_p12 = por %p2296_p11, %p2295_p10 }
   0xa   : > { %p2240_p5 = pnand %p2243_p3, %p2239_p4 }
   0xc   : > { %p2289_p7 = pneg %p2240_p5 }
   0xe   : > { %p2290_p8 = pnand %p2289_p7, %p2288_p6 }
  0x10   : > { %p2291_p9 = pneg %p2290_p8 }
  0x12   : > { %p2298_p13 = pnand %p2297_p12, %p2291_p9 }
  0x14   : > { %2301 = shalt.err (!%p2298_p13)
}
  0x15   : > { %s2314_s28 = smov [#allocation3]   ;;  %475 = sbr.rel (%p2430_p2) target bundleno = 6117 (0x17e5), region = 84 }
  0x16   : > { %2242 = dma.vmem_to_smem (!%p2240_p5), %s455_s25, 16, %s2314_s28, [#allocation4]  }
  0x1a   : > { %2307 = dma.done.wait (%p2243_p3), [#allocation4], 16  }
  0x1b   : > { %2309 = vsyncadd (%p2243_p3), [#allocation4], 4294967280 }
  0x1c   : > { %481 = sfence }
  0x1d   : > { %p526_p0 = scmp.lt.s32.totalorder %s1920_s22, 1  ;;  %v2315_v0 = vmov 0.0   ;;  %s2845_s17 = sld [smem:[#allocation6_spill]]  ;;  %vm2320_vm0 = vmmov 0   ;;  %v2321_v3 = vmov 0   ;;  %v539_v4 = vld [vmem:[%s2824_s3] sm:$0xff] }
  0x1e   : > { %2060 = vmatprep.subr.mxu0 %v2315_v0  ;;  %2087 = vmatprep.subr.mxu1 %v2315_v0  ;;  %s2842_s19 = smov 120   ;;  %s2317_s20 = smov 121   ;;  %v2471_v5 = vld [vmem:[%s2822_s1 + $0x4] ss:$0 sm:$0xff]  ;;  %v2477_v9 = vld [vmem:[%s2822_s1 + $0x3] ss:$0 sm:$0xff] }
  0x1f   : > { %s2852_s22 = smov (!%p526_p0, %s1920_s22), 1  ;;  %s2840_s23 = smov 1   ;;  %2084 = vmatprep.mubr.msk.f32.mxu0 %vm2320_vm0, %v2315_v0  ;;  %2099 = vmatprep.mubr.msk.f32.mxu1 %vm2320_vm0, %v2315_v0  ;;  %v1933_v17 = vld [vmem:[%s2822_s1 + $0x2] ss:$0 sm:$0xff]  ;;  %v1932_v20 = vld [vmem:[%s2822_s1 + $0x1] ss:$0 sm:$0xff] }
  0x20   : > { %s2838_s29 = sshll.u32 %s2852_s22, 4  ;;  %s2841_s24 = smov 8   ;;  %2273 = vset.pattern.permute.xlu0 %v2321_v3  ;;  %2274 = vset.pattern.permute.xlu1 %v2321_v3  ;;  %v1931_v24 = vld [vmem:[%s2822_s1] ss:$0 sm:$0xff]  ;;  %vm600_vm1 = vcmask 785408   ;;  %vm728_vm3 = vcmask 392192  }
  0x21   : > { %s2839_s25 = smov 9   ;;  %v538_v30 = vld [vmem:[%s2823_s2] sm:$0xff]  ;;  %s674_s26 = sld [smem:[#allocation3]]  ;;  %vm1130_vm6 = vcmask 130048   ;;  %vm1438_vm9 = vcmask 326656  }
  0x22   : > { %v682_v38 = vld [vmem:[%s2833_s12] sm:$0xff]  ;;  %s2323_s28 = smov 112   ;;  %s2324_s30 = smov 114  }
  0x23   : > { %s530_s18 = scalar_lea.vmem %s2845_s17, %s2838_s29  ;;  %v681_v49 = vld [vmem:[%s2827_s6] sm:$0xff]  ;;  %s2325_s0 = smov 2  }
  0x24   : > { %v537_v1 = vld [vmem:[%s530_s18 + $0x8] sm:$0xff]  ;;  %v536_v2 = vld [vmem:[%s530_s18] sm:$0xff] }
  0x25   : > { %586 = vrot.lane.b32.xlu0 %v537_v1, %s2842_s19  ;;  %575 = vrot.lane.b32.xlu1 %v537_v1, %s2317_s20 }
  0x27   : > { %v676_v33 = vstv %s674_s26 }
  0x29   : > { %584 = vrot.lane.b32.xlu0 %v536_v2, %s2842_s19  ;;  %573 = vrot.lane.b32.xlu1 %v536_v2, %s2317_s20 }
  0x2d   : > { %564 = vrot.lane.b32.xlu0 %v537_v1, %s2840_s23  ;;  %562 = vrot.lane.b32.xlu1 %v536_v2, %s2840_s23 }
  0x31   : > { %553 = vrot.lane.b32.xlu0 %v537_v1, %s2841_s24  ;;  %551 = vrot.lane.b32.xlu1 %v536_v2, %s2841_s24 }
  0x35   : > { %542 = vrot.lane.b32.xlu0 %v537_v1, %s2839_s25  ;;  %540 = vrot.lane.b32.xlu1 %v536_v2, %s2839_s25 }
  0x39   : > { %597 = vperm.xlu0 %2273, %v539_v4  }
  0x97   : > { %v587_v6 = vpop.permute.xlu0 %586  ;;  %v576_v7 = vpop.permute.xlu1 %575 }
  0x98   : > { %v594_v8 = vmul.f32 %v2471_v5, %v587_v6  ;;  %v583_v13 = vmul.f32 %v2477_v9, %v576_v7 }
  0x9a   : > { %2061 = vmatpush3.msra.mxu0 %v594_v8 }
  0x9b   : > { %v585_v10 = vpop.permute.xlu0 %584  ;;  %2062 = vmatprep.subr.mxu0 %v2315_v0  ;;  %v574_v11 = vpop.permute.xlu1 %573 }
  0x9c   : > { %v593_v12 = vmul.f32 %v2471_v5, %v585_v10  ;;  %v582_v14 = vmul.f32 %v2477_v9, %v574_v11  ;;  %v833_v11 = vld [vmem:[%s2834_s13] sm:$0xff] }
  0x9e   : > { %2063 = vmatpush3.msra.mxu0 %v593_v12 }
  0x9f   : > { %2064 = vmatprep.subr.mxu0 %v2315_v0  ;;  %v565_v15 = vpop.permute.xlu0 %564  ;;  %v563_v16 = vpop.permute.xlu1 %562 }
  0xa0   : > { %2065 = vmatpush3.msra.mxu0 %v583_v13  ;;  %v572_v19 = vmul.f32 %v1933_v17, %v565_v15  ;;  %v571_v22 = vmul.f32 %v1933_v17, %v563_v16 }
  0xa1   : > { %2066 = vmatprep.subr.mxu0 %v2315_v0 }
  0xa2   : > { %2067 = vmatpush3.msra.mxu0 %v582_v14 }
  0xa3   : > { %2068 = vmatprep.subr.mxu0 %v2315_v0  ;;  %v554_v18 = vpop.permute.xlu0 %553  ;;  %v552_v21 = vpop.permute.xlu1 %551 }
  0xa4   : > { %2069 = vmatpush3.msra.mxu0 %v537_v1  ;;  %v561_v23 = vmul.f32 %v1932_v20, %v554_v18  ;;  %v560_v26 = vmul.f32 %v1932_v20, %v552_v21  ;;  %v842_v1 = vld [vmem:[%s2835_s14] sm:$0xff]  ;;  %v1944_v21 = vld [vmem:[%s2833_s12 + $0x8] sm:$0xff] }
  0xa5   : > { %2070 = vmatprep.subr.mxu0 %v2315_v0 }
  0xa6   : > { %2071 = vmatpush3.msra.mxu0 %v536_v2 }
  0xa7   : > { %2072 = vmatprep.subr.mxu0 %v2315_v0  ;;  %v543_v25 = vpop.permute.xlu0 %542  ;;  %v541_v27 = vpop.permute.xlu1 %540 }
  0xa8   : > { %2073 = vmatpush3.msra.mxu0 %v572_v19  ;;  %v550_v28 = vmul.f32 %v1931_v24, %v543_v25  ;;  %v549_v29 = vmul.f32 %v1931_v24, %v541_v27 }
  0xa9   : > { %2074 = vmatprep.subr.mxu0 %v2315_v0 }
  0xaa   : > { %2075 = vmatpush3.msra.mxu0 %v571_v22 }
  0xab   : > { %2076 = vmatprep.subr.mxu0 %v2315_v0 }
  0xac   : > { %2077 = vmatpush3.msra.mxu0 %v561_v23  ;;  %v1949_v23 = vld [vmem:[%s2822_s1 + $0x9] ss:$0 sm:$0xff] }
  0xad   : > { %2078 = vmatprep.subr.mxu0 %v2315_v0 }
  0xae   : > { %2079 = vmatpush3.msra.mxu0 %v560_v26 }
  0xaf   : > { %2080 = vmatprep.subr.mxu0 %v2315_v0 }
  0xb0   : > { %2081 = vmatpush3.msra.mxu0 %v550_v28  ;;  %v1948_v28 = vld [vmem:[%s2822_s1 + $0x8] ss:$0 sm:$0xff] }
  0xb1   : > { %2082 = vmatprep.subr.mxu0 %v2315_v0 }
  0xb2   : > { %2083 = vmatpush3.msra.mxu0 %v549_v29 }
  0xb3   : > { %2085 = vmatmul.mubr.msk.f32.vlgmr.msra.gmra.mxu0 %vm600_vm1, %v538_v30  ;;  %1134 = vmatprep.subr.mxu0 %v2315_v0 }
  0xb4   : > { %v598_v31 = vpop.permute.xlu0 %597 }
 0x173   : > { %v670_v32 = vpop.f32.mrf.mxu0 }
 0x174   : > { %v671_v34 = vadd.f32 %v670_v32, %v598_v31 }
 0x175   : > { %v2086_v35 = vpop.f32.mrf.mxu0 }
 0x176   : > { %vm675_vm2 = vcmp.ge.f32.partialorder %v671_v34, 0.0  ;;  %v677_v36 = vmul.f32 %v676_v33, %v671_v34 }
 0x178   : > { %v2507_v37 = vsel %vm675_vm2, %v671_v34, %v677_v36  ;;  %v1947_v34 = vld [vmem:[%s2822_s1 + $0x7] ss:$0 sm:$0xff] }
 0x179   : > { %699 = vrot.lane.b32.xlu0 %v2507_v37, %s2840_s23  ;;  %715 = vrot.lane.b32.xlu1 %v2507_v37, %s2842_s19  ;;  %s1943_s19 = sld [smem:[#allocation3 + $0x1]] }
 0x17d   : > { %683 = vrot.lane.b32.xlu0 %v2507_v37, %s2839_s25  ;;  %707 = vrot.lane.b32.xlu1 %v2507_v37, %s2317_s20  ;;  %s2328_s25 = smov 96  }
 0x181   : > { %691 = vrot.lane.b32.xlu1 %v2507_v37, %s2841_s24 }
 0x185   : > { %725 = vperm.xlu1 %2274, %v682_v38  }
 0x1eb   : > { %v716_v39 = vpop.permute.xlu1 %715  ;;  %v700_v41 = vpop.permute.xlu0 %699 }
 0x1ec   : > { %v722_v40 = vmul.f32 %v2471_v5, %v716_v39  ;;  %v706_v45 = vmul.f32 %v1933_v17, %v700_v41  ;;  %v851_v17 = vstv %s1943_s19 }
 0x1ee   : > { %2088 = vmatpush3.msra.mxu1 %v722_v40  ;;  %v1946_v40 = vld [vmem:[%s2822_s1 + $0x6] ss:$0 sm:$0xff] }
 0x1ef   : > { %v708_v42 = vpop.permute.xlu1 %707  ;;  %2089 = vmatprep.subr.mxu1 %v2315_v0  ;;  %v684_v46 = vpop.permute.xlu0 %683 }
 0x1f0   : > { %v714_v43 = vmul.f32 %v2477_v9, %v708_v42  ;;  %v690_v48 = vmul.f32 %v1931_v24, %v684_v46 }
 0x1f2   : > { %2090 = vmatpush3.msra.mxu1 %v714_v43 }
 0x1f3   : > { %2091 = vmatprep.subr.mxu1 %v2315_v0  ;;  %v692_v44 = vpop.permute.xlu1 %691 }
 0x1f4   : > { %2092 = vmatpush3.msra.mxu1 %v2507_v37  ;;  %v698_v47 = vmul.f32 %v1932_v20, %v692_v44  ;;  %v1945_v44 = vld [vmem:[%s2822_s1 + $0x5] ss:$0 sm:$0xff] }
 0x1f5   : > { %2093 = vmatprep.subr.mxu1 %v2315_v0 }
 0x1f6   : > { %2094 = vmatpush3.msra.mxu1 %v706_v45 }
 0x1f7   : > { %2095 = vmatprep.subr.mxu1 %v2315_v0 }
 0x1f8   : > { %2096 = vmatpush3.msra.mxu1 %v698_v47 }
 0x1f9   : > { %2097 = vmatprep.subr.mxu1 %v2315_v0 }
 0x1fa   : > { %2098 = vmatpush3.msra.mxu1 %v690_v48  ;;  %v857_v48 = vld [vmem:[%s2828_s7] sm:$0xff] }
 0x1fb   : > { %2100 = vmatmul.mubr.msk.f32.vlgmr.msra.gmra.mxu1 %vm728_vm3, %v681_v49  ;;  %2102 = vmatprep.subr.mxu1 %v2315_v0 }
 0x1fc   : > { %2126 = vmatprep.mubr.msk.f32.mxu1 %vm2320_vm0, %v2315_v0 }
 0x200   : > { %v726_v50 = vpop.permute.xlu1 %725 }
 0x2bb   : > { %v798_v51 = vpop.f32.mrf.mxu1 }
 0x2bc   : > { %v799_v52 = vadd.f32 %v798_v51, %v726_v50 }
 0x2bd   : > { %v2101_v53 = vpop.f32.mrf.mxu1 }
 0x2be   : > { %802 = vadd.xlane.f32.xlu0 %v799_v52  ;;  %v1952_v53 = vld [vmem:[%s2835_s14 + $0x8] sm:$0xff] }
 0x347   : > { %v803_v54 = vpop.xlane.xlu0 %802 }
 0x348   : > { %v804_v55 = vrot.slane %v803_v54, 4 }
 0x34a   : > { %v805_v56 = vadd.f32 %v804_v55, %v803_v54 }
 0x34c   : > { %v806_v57 = vrot.slane %v805_v56, 2 }
 0x34e   : > { %v807_v58 = vadd.f32 %v806_v57, %v805_v56 }
 0x350   : > { %v808_v59 = vrot.slane %v807_v58, 1 }
 0x352   : > { %v809_v60 = vadd.f32 %v808_v59, %v807_v58  ;;  %v2613_v59 = vld [vmem:[%s2822_s1 + $0xe] ss:$0 sm:$0xff] }
 0x354   : > { %2199 = vpush %v809_v60 }
 0x385   : > { %s2200_s17 = spop %2199 }
 0x386   : > { %s813_s18 = smul.f32 0.0009765625, %s2200_s17  ;;  %s2326_s17 = smov 16  }
 0x388   : > { %v814_v61 = vstv %s813_s18  ;;  %s2327_s18 = smov 18  }
 0x389   : > { %v815_v62 = vsub.f32 %v799_v52, %v814_v61 }
 0x38b   : > { %v816_v63 = vmul.f32 %v815_v62, %v815_v62 }
 0x38d   : > { %817 = vadd.xlane.f32.xlu1 %v816_v63 }
 0x39e   : > { %845 = vperm.xlu1 %2274, %v842_v1  }
 0x3a2   : > { %904 = vrot.lane.b32.xlu1 %v2507_v37, %s2323_s28 }
 0x3a6   : > { %893 = vrot.lane.b32.xlu1 %v2507_v37, %s2324_s30 }
 0x3aa   : > { %882 = vrot.lane.b32.xlu1 %v2507_v37, %s2325_s0 }
 0x3ae   : > { %871 = vrot.lane.b32.xlu1 %v2507_v37, %s2326_s17 }
 0x3b2   : > { %860 = vrot.lane.b32.xlu1 %v2507_v37, %s2327_s18 }
 0x416   : > { %v818_v2 = vpop.xlane.xlu1 %817 }
 0x417   : > { %v819_v3 = vrot.slane %v818_v2, 4 }
 0x419   : > { %v820_v4 = vadd.f32 %v819_v3, %v818_v2 }
 0x41a   : > { %v846_v16 = vpop.permute.xlu1 %845 }
 0x41b   : > { %v821_v5 = vrot.slane %v820_v4, 2 }
 0x41d   : > { %v822_v6 = vadd.f32 %v821_v5, %v820_v4 }
 0x41e   : > { %v905_v22 = vpop.permute.xlu1 %904 }
 0x41f   : > { %v823_v7 = vrot.slane %v822_v6, 1  ;;  %v913_v27 = vmul.f32 %v1949_v23, %v905_v22 }
 0x421   : > { %v824_v8 = vadd.f32 %v823_v7, %v822_v6 }
 0x422   : > { %v894_v26 = vpop.permute.xlu1 %893 }
 0x423   : > { %2201 = vpush %v824_v8  ;;  %v902_v31 = vmul.f32 %v1948_v28, %v894_v26 }
 0x426   : > { %v883_v32 = vpop.permute.xlu1 %882 }
 0x427   : > { %v891_v39 = vmul.f32 %v1947_v34, %v883_v32 }
 0x42a   : > { %v872_v38 = vpop.permute.xlu1 %871 }
 0x42b   : > { %v880_v43 = vmul.f32 %v1946_v40, %v872_v38 }
 0x42e   : > { %v861_v45 = vpop.permute.xlu1 %860 }
 0x42f   : > { %v869_v47 = vmul.f32 %v1945_v44, %v861_v45 }
 0x454   : > { %s2202_s26 = spop %2201 }
 0x455   : > { %s828_s27 = smul.f32 0.0009765625, %s2202_s26 }
 0x457   : > { %s829_s29 = sadd.f32 1e-08, %s828_s27 }
 0x459   : > { %v830_v9 = vstv %s829_s29 }
 0x45a   : > { %2275 = vrsqrt.f32 %v830_v9 }
 0x467   : > { %v2276_v10 = vpop.eup %2275 }
 0x468   : > { %2203 = vpush %v2276_v10 }
 0x499   : > { %s2204_s24 = spop %2203 }
 0x49a   : > { %v834_v12 = vstv %s2204_s24 }
 0x49b   : > { %v835_v13 = vmul.f32 %v834_v12, %v833_v11 }
 0x49d   : > { %838 = vperm.xlu0 %2273, %v835_v13  }
 0x518   : > { %v839_v14 = vpop.permute.xlu0 %838 }
 0x519   : > { %v841_v15 = vmul.f32 %v839_v14, %v815_v62  ;;  %v1951_v14 = vld [vmem:[%s2834_s13 + $0x8] sm:$0xff] }
 0x51b   : > { %v848_v18 = vadd.f32 %v846_v16, %v841_v15 }
 0x51d   : > { %vm850_vm4 = vcmp.ge.f32.partialorder %v848_v18, 0.0  ;;  %v852_v19 = vmul.f32 %v851_v17, %v848_v18 }
 0x51f   : > { %v2553_v20 = vsel %vm850_vm4, %v848_v18, %v852_v19 }
 0x520   : > { %906 = vrot.lane.b32.xlu0 %v2553_v20, %s2323_s28  ;;  %s2329_s28 = smov 100  }
 0x524   : > { %895 = vrot.lane.b32.xlu0 %v2553_v20, %s2324_s30  ;;  %s1953_s30 = sld [smem:[#allocation3 + $0x2]] }
 0x528   : > { %884 = vrot.lane.b32.xlu0 %v2553_v20, %s2325_s0  ;;  %s2330_s0 = smov 4  }
 0x52a   : > { %v1044_v19 = vstv %s1953_s30 }
 0x52c   : > { %873 = vrot.lane.b32.xlu0 %v2553_v20, %s2326_s17 }
 0x530   : > { %862 = vrot.lane.b32.xlu0 %v2553_v20, %s2327_s18 }
 0x534   : > { %917 = vperm.xlu0 %2273, %v1944_v21  }
 0x592   : > { %v907_v24 = vpop.permute.xlu0 %906 }
 0x593   : > { %v914_v25 = vmul.f32 %v1949_v23, %v907_v24  ;;  %v1052_v24 = vld [vmem:[%s2829_s8 + $0x8] sm:$0xff] }
 0x594   : > { %1960 = vmatprep.mubr.msk.f32.mxu0 %vm1130_vm6, %v1052_v24 }
 0x595   : > { %2103 = vmatpush3.msra.mxu1 %v914_v25  ;;  %v1954_v25 = vld [vmem:[%s2833_s12 + $0x10] sm:$0xff] }
 0x596   : > { %2104 = vmatprep.subr.mxu1 %v2315_v0  ;;  %v896_v29 = vpop.permute.xlu0 %895 }
 0x597   : > { %v903_v30 = vmul.f32 %v1948_v28, %v896_v29  ;;  %2105 = vmatpush3.msra.mxu1 %v913_v27  ;;  %v1958_v27 = vld [vmem:[%s2822_s1 + $0xd] ss:$0 sm:$0xff] }
 0x598   : > { %2106 = vmatprep.subr.mxu1 %v2315_v0 }
 0x599   : > { %2107 = vmatpush3.msra.mxu1 %v903_v30 }
 0x59a   : > { %v885_v33 = vpop.permute.xlu0 %884  ;;  %2108 = vmatprep.subr.mxu1 %v2315_v0 }
 0x59b   : > { %2109 = vmatpush3.msra.mxu1 %v902_v31  ;;  %v892_v36 = vmul.f32 %v1947_v34, %v885_v33 }
 0x59c   : > { %2110 = vmatprep.subr.mxu1 %v2315_v0 }
 0x59d   : > { %2111 = vmatpush3.msra.mxu1 %v2553_v20 }
 0x59e   : > { %v874_v35 = vpop.permute.xlu0 %873  ;;  %2112 = vmatprep.subr.mxu1 %v2315_v0 }
 0x59f   : > { %2113 = vmatpush3.msra.mxu1 %v2507_v37  ;;  %v881_v41 = vmul.f32 %v1946_v40, %v874_v35 }
 0x5a0   : > { %2114 = vmatprep.subr.mxu1 %v2315_v0 }
 0x5a1   : > { %2115 = vmatpush3.msra.mxu1 %v892_v36  ;;  %v1957_v36 = vld [vmem:[%s2822_s1 + $0xc] ss:$0 sm:$0xff] }
 0x5a2   : > { %2116 = vmatprep.subr.mxu1 %v2315_v0  ;;  %v863_v42 = vpop.permute.xlu0 %862 }
 0x5a3   : > { %2117 = vmatpush3.msra.mxu1 %v891_v39  ;;  %v870_v46 = vmul.f32 %v1945_v44, %v863_v42  ;;  %v1956_v44 = vld [vmem:[%s2822_s1 + $0xb] ss:$0 sm:$0xff] }
 0x5a4   : > { %2118 = vmatprep.subr.mxu1 %v2315_v0 }
 0x5a5   : > { %2119 = vmatpush3.msra.mxu1 %v881_v41 }
 0x5a6   : > { %2120 = vmatprep.subr.mxu1 %v2315_v0 }
 0x5a7   : > { %2121 = vmatpush3.msra.mxu1 %v880_v43 }
 0x5a8   : > { %2122 = vmatprep.subr.mxu1 %v2315_v0 }
 0x5a9   : > { %2123 = vmatpush3.msra.mxu1 %v870_v46 }
 0x5aa   : > { %2124 = vmatprep.subr.mxu1 %v2315_v0 }
 0x5ab   : > { %2125 = vmatpush3.msra.mxu1 %v869_v47 }
 0x5ac   : > { %2127 = vmatmul.mubr.msk.f32.vlgmr.msra.gmra.mxu1 %vm600_vm1, %v857_v48  ;;  %2129 = vmatprep.subr.mxu1 %v2315_v0  ;;  %v1955_v48 = vld [vmem:[%s2822_s1 + $0xa] ss:$0 sm:$0xff] }
 0x5ad   : > { %2153 = vmatprep.mubr.msk.f32.mxu1 %vm2320_vm0, %v2315_v0 }
 0x5af   : > { %v918_v49 = vpop.permute.xlu0 %917 }
 0x66c   : > { %v989_v50 = vpop.f32.mrf.mxu1 }
 0x66d   : > { %v990_v51 = vadd.f32 %v989_v50, %v918_v49 }
 0x66e   : > { %v2128_v52 = vpop.f32.mrf.mxu1 }
 0x66f   : > { %993 = vadd.xlane.f32.xlu1 %v990_v51 }
 0x680   : > { %1038 = vperm.xlu1 %2274, %v1952_v53  }
 0x684   : > { %1111 = vrot.lane.b32.xlu1 %v2507_v37, %s2328_s25 }
 0x688   : > { %1099 = vrot.lane.b32.xlu1 %v2553_v20, %s2329_s28 }
 0x6f8   : > { %v994_v54 = vpop.xlane.xlu1 %993 }
 0x6f9   : > { %v995_v55 = vrot.slane %v994_v54, 4 }
 0x6fb   : > { %v996_v56 = vadd.f32 %v995_v55, %v994_v54 }
 0x6fc   : > { %v1039_v57 = vpop.permute.xlu1 %1038 }
 0x6fd   : > { %v997_v58 = vrot.slane %v996_v56, 2 }
 0x6ff   : > { %v998_v60 = vadd.f32 %v997_v58, %v996_v56 }
 0x700   : > { %v1112_v61 = vpop.permute.xlu1 %1111 }
 0x701   : > { %v1122_v62 = vmul.f32 %v2613_v59, %v1112_v61  ;;  %v999_v63 = vrot.slane %v998_v60, 1 }
 0x703   : > { %1135 = vmatpush1.msra.mxu0 %v1122_v62  ;;  %v1000_v1 = vadd.f32 %v999_v63, %v998_v60  ;;  %v1051_v60 = vld [vmem:[%s2829_s8] sm:$0xff] }
 0x704   : > { %1136 = vmatprep.subr.mxu0 %v2315_v0  ;;  %v1100_v26 = vpop.permute.xlu1 %1099 }
 0x705   : > { %2205 = vpush %v1000_v1  ;;  %v1109_v31 = vmul.f32 %v1958_v27, %v1100_v26 }
 0x736   : > { %s2206_s17 = spop %2205 }
 0x737   : > { %s1004_s18 = smul.f32 0.0009765625, %s2206_s17  ;;  %s2331_s17 = smov 32  }
 0x739   : > { %v1005_v2 = vstv %s1004_s18  ;;  %s2332_s18 = smov 36  }
 0x73a   : > { %v1006_v3 = vsub.f32 %v990_v51, %v1005_v2 }
 0x73c   : > { %v1007_v4 = vmul.f32 %v1006_v3, %v1006_v3 }
 0x73e   : > { %1008 = vadd.xlane.f32.xlu0 %v1007_v4 }
 0x7c7   : > { %v1009_v5 = vpop.xlane.xlu0 %1008 }
 0x7c8   : > { %v1010_v6 = vrot.slane %v1009_v5, 4 }
 0x7ca   : > { %v1011_v7 = vadd.f32 %v1010_v6, %v1009_v5 }
 0x7cc   : > { %v1012_v8 = vrot.slane %v1011_v7, 2 }
 0x7ce   : > { %v1013_v9 = vadd.f32 %v1012_v8, %v1011_v7 }
 0x7d0   : > { %v1014_v10 = vrot.slane %v1013_v9, 1 }
 0x7d2   : > { %v1015_v11 = vadd.f32 %v1014_v10, %v1013_v9 }
 0x7d4   : > { %2207 = vpush %v1015_v11 }
 0x805   : > { %s2208_s26 = spop %2207 }
 0x806   : > { %s1019_s27 = smul.f32 0.0009765625, %s2208_s26  ;;  %s1963_s26 = sld [smem:[#allocation3 + $0x3]] }
 0x808   : > { %s1020_s29 = sadd.f32 1e-08, %s1019_s27 }
 0x80a   : > { %v1021_v12 = vstv %s1020_s29 }
 0x80b   : > { %2277 = vrsqrt.f32 %v1021_v12 }
 0x818   : > { %v2278_v13 = vpop.eup %2277 }
 0x819   : > { %2209 = vpush %v2278_v13 }
 0x84a   : > { %s2210_s24 = spop %2209 }
 0x84b   : > { %v1026_v15 = vstv %s2210_s24 }
 0x84c   : > { %v1027_v16 = vmul.f32 %v1951_v14, %v1026_v15 }
 0x84e   : > { %1030 = vperm.xlu0 %2273, %v1027_v16  }
 0x8c9   : > { %v1031_v17 = vpop.permute.xlu0 %1030 }
 0x8ca   : > { %v1033_v18 = vmul.f32 %v1031_v17, %v1006_v3 }
 0x8cc   : > { %v1041_v21 = vadd.f32 %v1039_v57, %v1033_v18 }
 0x8ce   : > { %vm1043_vm5 = vcmp.ge.f32.partialorder %v1041_v21, 0.0  ;;  %v1045_v22 = vmul.f32 %v1044_v19, %v1041_v21 }
 0x8d0   : > { %v2620_v23 = vsel %vm1043_vm5, %v1041_v21, %v1045_v22  ;;  %v1961_v22 = vld [vmem:[%s2834_s13 + $0x10] sm:$0xff] }
 0x8d1   : > { %1087 = vrot.lane.b32.xlu1 %v2620_v23, %s2330_s0  ;;  %1101 = vrot.lane.b32.xlu0 %v2620_v23, %s2329_s28 }
 0x8d5   : > { %1083 = vrot.lane.b32.xlu1 %v2507_v37, %s2330_s0  ;;  %1097 = vrot.lane.b32.xlu0 %v2507_v37, %s2329_s28  ;;  %s2333_s28 = smov 64  }
 0x8d9   : > { %1071 = vrot.lane.b32.xlu1 %v2553_v20, %s2331_s17  ;;  %1085 = vrot.lane.b32.xlu0 %v2553_v20, %s2330_s0 }
 0x8dd   : > { %1059 = vrot.lane.b32.xlu1 %v2620_v23, %s2332_s18  ;;  %1073 = vrot.lane.b32.xlu0 %v2620_v23, %s2331_s17 }
 0x8e1   : > { %1055 = vrot.lane.b32.xlu1 %v2507_v37, %s2332_s18  ;;  %1069 = vrot.lane.b32.xlu0 %v2507_v37, %s2331_s17 }
 0x8e5   : > { %1113 = vrot.lane.b32.xlu1 %v2553_v20, %s2328_s25  ;;  %1057 = vrot.lane.b32.xlu0 %v2553_v20, %s2332_s18 }
 0x8e9   : > { %1115 = vrot.lane.b32.xlu0 %v2620_v23, %s2328_s25 }
 0x8ed   : > { %1127 = vperm.xlu0 %2273, %v1954_v25  }
 0x943   : > { %v1102_v28 = vpop.permute.xlu0 %1101  ;;  %v1088_v29 = vpop.permute.xlu1 %1087 }
 0x944   : > { %v1110_v30 = vmul.f32 %v1958_v27, %v1102_v28  ;;  %v1096_v40 = vmul.f32 %v1957_v36, %v1088_v29  ;;  %v1255_v29 = vstv %s1963_s26  ;;  %s1975_s26 = sld [smem:[#allocation3 + $0x5]] }
 0x946   : > { %1137 = vmatpush1.msra.mxu0 %v1110_v30 }
 0x947   : > { %v1098_v32 = vpop.permute.xlu0 %1097  ;;  %1138 = vmatprep.subr.mxu0 %v2315_v0  ;;  %v1084_v34 = vpop.permute.xlu1 %1083 }
 0x948   : > { %v1108_v33 = vmul.f32 %v1958_v27, %v1098_v32  ;;  %1139 = vmatpush1.msra.mxu0 %v1109_v31  ;;  %v1094_v43 = vmul.f32 %v1957_v36, %v1084_v34 }
 0x949   : > { %1140 = vmatprep.subr.mxu0 %v2315_v0 }
 0x94a   : > { %1141 = vmatpush1.msra.mxu0 %v1108_v33  ;;  %v1964_v33 = vld [vmem:[%s2833_s12 + $0x18] sm:$0xff] }
 0x94b   : > { %v1086_v35 = vpop.permute.xlu0 %1085  ;;  %1142 = vmatprep.subr.mxu0 %v2315_v0  ;;  %v1072_v38 = vpop.permute.xlu1 %1071 }
 0x94c   : > { %1143 = vmatpush1.msra.mxu0 %v2620_v23  ;;  %v1095_v41 = vmul.f32 %v1957_v36, %v1086_v35  ;;  %v1081_v47 = vmul.f32 %v1956_v44, %v1072_v38  ;;  %v1966_v35 = vld [vmem:[%s2822_s1 + $0x10] ss:$0 sm:$0xff] }
 0x94d   : > { %1144 = vmatprep.subr.mxu0 %v2315_v0 }
 0x94e   : > { %1145 = vmatpush1.msra.mxu0 %v2553_v20 }
 0x94f   : > { %v1074_v39 = vpop.permute.xlu0 %1073  ;;  %1146 = vmatprep.subr.mxu0 %v2315_v0  ;;  %v1060_v45 = vpop.permute.xlu1 %1059 }
 0x950   : > { %1147 = vmatpush1.msra.mxu0 %v2507_v37  ;;  %v1082_v46 = vmul.f32 %v1956_v44, %v1074_v39  ;;  %v1068_v52 = vmul.f32 %v1955_v48, %v1060_v45 }
 0x951   : > { %1148 = vmatprep.subr.mxu0 %v2315_v0 }
 0x952   : > { %1149 = vmatpush1.msra.mxu0 %v1096_v40 }
 0x953   : > { %v1070_v42 = vpop.permute.xlu0 %1069  ;;  %1150 = vmatprep.subr.mxu0 %v2315_v0  ;;  %v1056_v51 = vpop.permute.xlu1 %1055 }
 0x954   : > { %1151 = vmatpush1.msra.mxu0 %v1095_v41  ;;  %v1080_v50 = vmul.f32 %v1956_v44, %v1070_v42  ;;  %v1066_v55 = vmul.f32 %v1955_v48, %v1056_v51  ;;  %v1965_v44 = vld [vmem:[%s2822_s1 + $0xf] ss:$0 sm:$0xff] }
 0x955   : > { %1152 = vmatprep.subr.mxu0 %v2315_v0 }
 0x956   : > { %1153 = vmatpush1.msra.mxu0 %v1094_v43 }
 0x957   : > { %1154 = vmatprep.subr.mxu0 %v2315_v0  ;;  %v1058_v49 = vpop.permute.xlu0 %1057  ;;  %v1114_v56 = vpop.permute.xlu1 %1113 }
 0x958   : > { %1155 = vmatpush1.msra.mxu0 %v1082_v46  ;;  %v1067_v53 = vmul.f32 %v1955_v48, %v1058_v49  ;;  %v1123_v58 = vmul.f32 %v2613_v59, %v1114_v56  ;;  %v1263_v49 = vld [vmem:[%s2830_s9] sm:$0xff] }
 0x959   : > { %1156 = vmatprep.subr.mxu0 %v2315_v0 }
 0x95a   : > { %1157 = vmatpush1.msra.mxu0 %v1081_v47 }
 0x95b   : > { %1158 = vmatprep.subr.mxu0 %v2315_v0  ;;  %v1116_v54 = vpop.permute.xlu0 %1115 }
 0x95c   : > { %1159 = vmatpush1.msra.mxu0 %v1080_v50  ;;  %v1124_v57 = vmul.f32 %v2613_v59, %v1116_v54  ;;  %v1962_v59 = vld [vmem:[%s2835_s14 + $0x10] sm:$0xff] }
 0x95d   : > { %1160 = vmatprep.subr.mxu0 %v2315_v0 }
 0x95e   : > { %1161 = vmatpush1.msra.mxu0 %v1068_v52 }
 0x95f   : > { %1162 = vmatprep.subr.mxu0 %v2315_v0 }
 0x960   : > { %1163 = vmatpush1.msra.mxu0 %v1067_v53 }
 0x961   : > { %1164 = vmatprep.subr.mxu0 %v2315_v0 }
 0x962   : > { %1165 = vmatpush1.msra.mxu0 %v1066_v55 }
 0x963   : > { %1194 = vmatprep.subr.mxu0 %v2315_v0 }
 0x964   : > { %1195 = vmatpush2.msra.mxu0 %v1124_v57 }
 0x965   : > { %1196 = vmatprep.subr.mxu0 %v2315_v0 }
 0x966   : > { %1197 = vmatpush2.msra.mxu0 %v1123_v58 }
 0x967   : > { %1199 = vmatmul.mubr.f32.vlgmr.msra.gmra.mxu0 %v1051_v60  ;;  %2156 = vmatprep.subr.mxu0 %v2315_v0 }
 0x968   : > { %2166 = vmatprep.mubr.msk.f32.mxu0 %vm2320_vm0, %v2315_v0  ;;  %v1128_v61 = vpop.permute.xlu0 %1127 }
 0xa27   : > { %v1200_v62 = vpop.f32.mrf.mxu0 }
 0xa28   : > { %v1201_v63 = vadd.f32 %v1200_v62, %v1128_v61 }
 0xa29   : > { %v1202_v1 = vpop.f32.mrf.mxu0 }
 0xa2a   : > { %1204 = vadd.xlane.f32.xlu1 %v1201_v63 }
 0xa3b   : > { %1249 = vperm.xlu1 %2274, %v1962_v59   ;;  %v1969_v59 = vld [vmem:[%s2835_s14 + $0x18] sm:$0xff] }
 0xab3   : > { %v1205_v2 = vpop.xlane.xlu1 %1204 }
 0xab4   : > { %v1206_v3 = vrot.slane %v1205_v2, 4 }
 0xab6   : > { %v1207_v4 = vadd.f32 %v1206_v3, %v1205_v2 }
 0xab7   : > { %v1250_v28 = vpop.permute.xlu1 %1249 }
 0xab8   : > { %v1208_v5 = vrot.slane %v1207_v4, 2 }
 0xaba   : > { %v1209_v6 = vadd.f32 %v1208_v5, %v1207_v4 }
 0xabc   : > { %v1210_v7 = vrot.slane %v1209_v6, 1 }
 0xabe   : > { %v1211_v8 = vadd.f32 %v1210_v7, %v1209_v6 }
 0xac0   : > { %2211 = vpush %v1211_v8 }
 0xaf1   : > { %s2212_s19 = spop %2211 }
 0xaf2   : > { %s1215_s23 = smul.f32 0.0009765625, %s2212_s19 }
 0xaf4   : > { %v1216_v9 = vstv %s1215_s23 }
 0xaf5   : > { %v1217_v10 = vsub.f32 %v1201_v63, %v1216_v9 }
 0xaf7   : > { %v1218_v11 = vmul.f32 %v1217_v10, %v1217_v10 }
 0xaf9   : > { %1219 = vadd.xlane.f32.xlu0 %v1218_v11  ;;  %v1968_v11 = vld [vmem:[%s2834_s13 + $0x18] sm:$0xff] }
 0xb82   : > { %v1220_v12 = vpop.xlane.xlu0 %1219 }
 0xb83   : > { %v1221_v13 = vrot.slane %v1220_v12, 4 }
 0xb85   : > { %v1222_v14 = vadd.f32 %v1221_v13, %v1220_v12 }
 0xb87   : > { %v1223_v15 = vrot.slane %v1222_v14, 2 }
 0xb89   : > { %v1224_v16 = vadd.f32 %v1223_v15, %v1222_v14  ;;  %v1971_v14 = vld [vmem:[%s2833_s12 + $0x20] sm:$0xff] }
 0xb8b   : > { %v1225_v17 = vrot.slane %v1224_v16, 1 }
 0xb8d   : > { %v1226_v18 = vadd.f32 %v1225_v17, %v1224_v16 }
 0xb8f   : > { %2213 = vpush %v1226_v18 }
 0xbc0   : > { %s2214_s25 = spop %2213 }
 0xbc1   : > { %s1230_s24 = smul.f32 0.0009765625, %s2214_s25 }
 0xbc3   : > { %s1231_s30 = sadd.f32 1e-08, %s1230_s24 }
 0xbc5   : > { %v1232_v19 = vstv %s1231_s30 }
 0xbc6   : > { %2279 = vrsqrt.f32 %v1232_v19 }
 0xbd3   : > { %v2280_v21 = vpop.eup %2279 }
 0xbd4   : > { %2215 = vpush %v2280_v21 }
 0xc05   : > { %s2216_s18 = spop %2215 }
 0xc06   : > { %v1237_v24 = vstv %s2216_s18 }
 0xc07   : > { %v1238_v25 = vmul.f32 %v1961_v22, %v1237_v24  ;;  %v1430_v24 = vld [vmem:[%s2831_s10] sm:$0xff] }
 0xc09   : > { %1241 = vperm.xlu0 %2273, %v1238_v25  }
 0xc0d   : > { %1270 = vrot.lane.b32.xlu0 %v2620_v23, %s2333_s28 }
 0xc11   : > { %1266 = vrot.lane.b32.xlu0 %v2507_v37, %s2333_s28 }
 0xc84   : > { %v1242_v26 = vpop.permute.xlu0 %1241 }
 0xc85   : > { %v1244_v27 = vmul.f32 %v1242_v26, %v1217_v10 }
 0xc87   : > { %v1252_v30 = vadd.f32 %v1250_v28, %v1244_v27 }
 0xc88   : > { %v1271_v34 = vpop.permute.xlu0 %1270 }
 0xc89   : > { %v1256_v31 = vmul.f32 %v1255_v29, %v1252_v30  ;;  %vm1254_vm7 = vcmp.ge.f32.partialorder %v1252_v30, 0.0  ;;  %v1290_v39 = vmul.f32 %v1966_v35, %v1271_v34  ;;  %v1281_v46 = vmul.f32 %v1965_v44, %v1271_v34  ;;  %v1974_v29 = vld [vmem:[%s2835_s14 + $0x20] sm:$0xff] }
 0xc8b   : > { %v2692_v32 = vsel %vm1254_vm7, %v1252_v30, %v1256_v31  ;;  %v1976_v30 = vld [vmem:[%s2833_s12 + $0x28] sm:$0xff] }
 0xc8c   : > { %1272 = vrot.lane.b32.xlu1 %v2692_v32, %s2333_s28  ;;  %v1267_v40 = vpop.permute.xlu0 %1266 }
 0xc8d   : > { %v1288_v43 = vmul.f32 %v1966_v35, %v1267_v40  ;;  %v1279_v48 = vmul.f32 %v1965_v44, %v1267_v40 }
 0xc90   : > { %1268 = vrot.lane.b32.xlu1 %v2553_v20, %s2333_s28 }
 0xc94   : > { %1294 = vperm.xlu1 %2274, %v1964_v33  }
 0xcfe   : > { %v1273_v36 = vpop.permute.xlu1 %1272 }
 0xcff   : > { %v1291_v38 = vmul.f32 %v1966_v35, %v1273_v36  ;;  %v1282_v45 = vmul.f32 %v1965_v44, %v1273_v36 }
 0xd01   : > { %2130 = vmatpush3.msra.mxu1 %v1291_v38 }
 0xd02   : > { %2131 = vmatprep.subr.mxu1 %v2315_v0  ;;  %v1269_v41 = vpop.permute.xlu1 %1268 }
 0xd03   : > { %v1289_v42 = vmul.f32 %v1966_v35, %v1269_v41  ;;  %2132 = vmatpush3.msra.mxu1 %v1290_v39  ;;  %v1280_v47 = vmul.f32 %v1965_v44, %v1269_v41 }
 0xd04   : > { %2133 = vmatprep.subr.mxu1 %v2315_v0 }
 0xd05   : > { %2134 = vmatpush3.msra.mxu1 %v1289_v42 }
 0xd06   : > { %2135 = vmatprep.subr.mxu1 %v2315_v0 }
 0xd07   : > { %2136 = vmatpush3.msra.mxu1 %v1288_v43 }
 0xd08   : > { %2137 = vmatprep.subr.mxu1 %v2315_v0 }
 0xd09   : > { %2138 = vmatpush3.msra.mxu1 %v2692_v32 }
 0xd0a   : > { %2139 = vmatprep.subr.mxu1 %v2315_v0 }
 0xd0b   : > { %2140 = vmatpush3.msra.mxu1 %v2620_v23 }
 0xd0c   : > { %2141 = vmatprep.subr.mxu1 %v2315_v0 }
 0xd0d   : > { %2142 = vmatpush3.msra.mxu1 %v2553_v20 }
 0xd0e   : > { %2143 = vmatprep.subr.mxu1 %v2315_v0 }
 0xd0f   : > { %2144 = vmatpush3.msra.mxu1 %v2507_v37  ;;  %v1295_v50 = vpop.permute.xlu1 %1294 }
 0xd10   : > { %2145 = vmatprep.subr.mxu1 %v2315_v0 }
 0xd11   : > { %2146 = vmatpush3.msra.mxu1 %v1282_v45 }
 0xd12   : > { %2147 = vmatprep.subr.mxu1 %v2315_v0 }
 0xd13   : > { %2148 = vmatpush3.msra.mxu1 %v1281_v46 }
 0xd14   : > { %2149 = vmatprep.subr.mxu1 %v2315_v0 }
 0xd15   : > { %2150 = vmatpush3.msra.mxu1 %v1280_v47 }
 0xd16   : > { %2151 = vmatprep.subr.mxu1 %v2315_v0 }
 0xd17   : > { %2152 = vmatpush3.msra.mxu1 %v1279_v48 }
 0xd18   : > { %2154 = vmatmul.mubr.msk.f32.vlgmr.msra.gmra.mxu1 %vm600_vm1, %v1263_v49  ;;  %2169 = vmatprep.subr.mxu1 %v2315_v0 }
 0xd19   : > { %2181 = vmatprep.mubr.msk.f32.mxu1 %vm2320_vm0, %v2315_v0 }
 0xdd8   : > { %v1366_v51 = vpop.f32.mrf.mxu1 }
 0xdd9   : > { %v1367_v52 = vadd.f32 %v1366_v51, %v1295_v50 }
 0xdda   : > { %v2155_v53 = vpop.f32.mrf.mxu1 }
 0xddb   : > { %1370 = vadd.xlane.f32.xlu0 %v1367_v52 }
 0xe64   : > { %v1371_v54 = vpop.xlane.xlu0 %1370 }
 0xe65   : > { %v1372_v55 = vrot.slane %v1371_v54, 4 }
 0xe67   : > { %v1373_v56 = vadd.f32 %v1372_v55, %v1371_v54 }
 0xe69   : > { %v1374_v57 = vrot.slane %v1373_v56, 2 }
 0xe6b   : > { %v1375_v58 = vadd.f32 %v1374_v57, %v1373_v56 }
 0xe6d   : > { %v1376_v60 = vrot.slane %v1375_v58, 1 }
 0xe6f   : > { %v1377_v61 = vadd.f32 %v1376_v60, %v1375_v58  ;;  %v1563_v58 = vstv %s1975_s26 }
 0xe71   : > { %2217 = vpush %v1377_v61 }
 0xea2   : > { %s2218_s17 = spop %2217 }
 0xea3   : > { %s1381_s18 = smul.f32 0.0009765625, %s2218_s17  ;;  %s1970_s17 = sld [smem:[#allocation3 + $0x4]] }
 0xea5   : > { %v1382_v62 = vstv %s1381_s18 }
 0xea6   : > { %v1383_v63 = vsub.f32 %v1367_v52, %v1382_v62  ;;  %v1973_v52 = vld [vmem:[%s2834_s13 + $0x20] sm:$0xff] }
 0xea8   : > { %v1384_v1 = vmul.f32 %v1383_v63, %v1383_v63 }
 0xea9   : > { %v1421_v18 = vstv %s1970_s17 }
 0xeaa   : > { %1385 = vadd.xlane.f32.xlu1 %v1384_v1 }
 0xebb   : > { %1415 = vperm.xlu1 %2274, %v1969_v59  }
 0xf33   : > { %v1386_v2 = vpop.xlane.xlu1 %1385 }
 0xf34   : > { %v1387_v3 = vrot.slane %v1386_v2, 4 }
 0xf36   : > { %v1388_v4 = vadd.f32 %v1387_v3, %v1386_v2 }
 0xf37   : > { %v1416_v17 = vpop.permute.xlu1 %1415 }
 0xf38   : > { %v1389_v5 = vrot.slane %v1388_v4, 2 }
 0xf3a   : > { %v1390_v6 = vadd.f32 %v1389_v5, %v1388_v4 }
 0xf3c   : > { %v1391_v7 = vrot.slane %v1390_v6, 1 }
 0xf3e   : > { %v1392_v8 = vadd.f32 %v1391_v7, %v1390_v6 }
 0xf40   : > { %2219 = vpush %v1392_v8 }
 0xf71   : > { %s2220_s27 = spop %2219 }
 0xf72   : > { %s1396_s29 = smul.f32 0.0009765625, %s2220_s27  ;;  %s1980_s27 = sld [smem:[#allocation3 + $0x6]] }
 0xf74   : > { %s1397_s19 = sadd.f32 1e-08, %s1396_s29 }
 0xf76   : > { %v1398_v9 = vstv %s1397_s19 }
 0xf77   : > { %2281 = vrsqrt.f32 %v1398_v9  ;;  %v1979_v9 = vld [vmem:[%s2835_s14 + $0x28] sm:$0xff] }
 0xf84   : > { %v2282_v10 = vpop.eup %2281 }
 0xf85   : > { %2221 = vpush %v2282_v10 }
 0xfb6   : > { %s2222_s24 = spop %2221 }
 0xfb7   : > { %v1403_v12 = vstv %s2222_s24 }
 0xfb8   : > { %v1404_v13 = vmul.f32 %v1968_v11, %v1403_v12 }
 0xfba   : > { %1407 = vperm.xlu0 %2273, %v1404_v13  }
 0xfbe   : > { %1435 = vperm.xlu0 %2273, %v1971_v14  }
0x1035   : > { %v1408_v15 = vpop.permute.xlu0 %1407 }
0x1036   : > { %v1410_v16 = vmul.f32 %v1408_v15, %v1383_v63  ;;  %v1573_v63 = vld [vmem:[%s2832_s11] sm:$0xff] }
0x1038   : > { %v1418_v19 = vadd.f32 %v1416_v17, %v1410_v16 }
0x1039   : > { %v1436_v25 = vpop.permute.xlu0 %1435 }
0x103a   : > { %v1422_v21 = vmul.f32 %v1421_v18, %v1418_v19  ;;  %vm1420_vm8 = vcmp.ge.f32.partialorder %v1418_v19, 0.0 }
0x103c   : > { %v2736_v22 = vsel %vm1420_vm8, %v1418_v19, %v1422_v21  ;;  %v1978_v19 = vld [vmem:[%s2834_s13 + $0x28] sm:$0xff] }
0x103d   : > { %2157 = vmatpush3.msra.mxu0 %v2736_v22 }
0x103e   : > { %2158 = vmatprep.subr.mxu0 %v2315_v0 }
0x103f   : > { %2159 = vmatpush3.msra.mxu0 %v2692_v32 }
0x1040   : > { %2160 = vmatprep.subr.mxu0 %v2315_v0 }
0x1041   : > { %2161 = vmatpush3.msra.mxu0 %v2620_v23 }
0x1042   : > { %2162 = vmatprep.subr.mxu0 %v2315_v0 }
0x1043   : > { %2163 = vmatpush3.msra.mxu0 %v2553_v20 }
0x1044   : > { %2164 = vmatprep.subr.mxu0 %v2315_v0 }
0x1045   : > { %2165 = vmatpush3.msra.mxu0 %v2507_v37 }
0x1046   : > { %2167 = vmatmul.mubr.msk.f32.vlgmr.msra.gmra.mxu0 %vm1438_vm9, %v1430_v24 }
0x1106   : > { %v1508_v26 = vpop.f32.mrf.mxu0 }
0x1107   : > { %v1509_v27 = vadd.f32 %v1508_v26, %v1436_v25 }
0x1108   : > { %v2168_v28 = vpop.f32.mrf.mxu0 }
0x1109   : > { %1512 = vadd.xlane.f32.xlu1 %v1509_v27 }
0x111a   : > { %1557 = vperm.xlu1 %2274, %v1974_v29  }
0x111e   : > { %1578 = vperm.xlu1 %2274, %v1976_v30  }
0x1192   : > { %v1513_v31 = vpop.xlane.xlu1 %1512 }
0x1193   : > { %v1514_v33 = vrot.slane %v1513_v31, 4 }
0x1195   : > { %v1515_v34 = vadd.f32 %v1514_v33, %v1513_v31  ;;  %v1708_v31 = vld [vmem:[%s2825_s4] sm:$0xff] }
0x1196   : > { %v1558_v57 = vpop.permute.xlu1 %1557  ;;  %2196 = vmatprep.mubr.msk.f32.mxu0 %vm728_vm3, %v1708_v31  ;;  %v1710_v33 = vld [vmem:[%s2826_s5] sm:$0xff] }
0x1197   : > { %v1516_v35 = vrot.slane %v1515_v34, 2 }
0x1199   : > { %v1517_v36 = vadd.f32 %v1516_v35, %v1515_v34  ;;  %v1711_v34 = vld [vmem:[%s2826_s5 + $0x8] sm:$0xff]  ;;  %v1985_v35 = vld [vmem:[%s2822_s1 + $0x4] ss:$0 sm:$0xff] }
0x119a   : > { %v1579_v1 = vpop.permute.xlu1 %1578 }
0x119b   : > { %v1518_v38 = vrot.slane %v1517_v36, 1 }
0x119d   : > { %v1519_v39 = vadd.f32 %v1518_v38, %v1517_v36  ;;  %v1984_v36 = vld [vmem:[%s2822_s1 + $0x3] ss:$0 sm:$0xff] }
0x119f   : > { %2223 = vpush %v1519_v39 }
0x11d0   : > { %s2224_s23 = spop %2223 }
0x11d1   : > { %s1523_s25 = smul.f32 0.0009765625, %s2224_s23 }
0x11d3   : > { %v1524_v40 = vstv %s1523_s25  ;;  %s2847_s25 = smov 8  }
0x11d4   : > { %v1525_v41 = vsub.f32 %v1509_v27, %v1524_v40  ;;  %v1705_v27 = vstv %s1980_s27 }
0x11d6   : > { %v1526_v42 = vmul.f32 %v1525_v41, %v1525_v41 }
0x11d8   : > { %1527 = vadd.xlane.f32.xlu0 %v1526_v42  ;;  %v1983_v42 = vld [vmem:[%s2822_s1 + $0x2] ss:$0 sm:$0xff] }
0x1261   : > { %v1528_v43 = vpop.xlane.xlu0 %1527 }
0x1262   : > { %v1529_v44 = vrot.slane %v1528_v43, 4 }
0x1264   : > { %v1530_v45 = vadd.f32 %v1529_v44, %v1528_v43  ;;  %v1982_v44 = vld [vmem:[%s2822_s1 + $0x1] ss:$0 sm:$0xff] }
0x1266   : > { %v1531_v46 = vrot.slane %v1530_v45, 2 }
0x1268   : > { %v1532_v47 = vadd.f32 %v1531_v46, %v1530_v45 }
0x126a   : > { %v1533_v48 = vrot.slane %v1532_v47, 1 }
0x126c   : > { %v1534_v49 = vadd.f32 %v1533_v48, %v1532_v47  ;;  %v1981_v47 = vld [vmem:[%s2822_s1] ss:$0 sm:$0xff] }
0x126e   : > { %2225 = vpush %v1534_v49 }
0x129f   : > { %s2226_s24 = spop %2225 }
0x12a0   : > { %s1538_s30 = smul.f32 0.0009765625, %s2226_s24  ;;  %s2848_s24 = smov 1  }
0x12a2   : > { %s1539_s0 = sadd.f32 1e-08, %s1538_s30 }
0x12a4   : > { %v1540_v50 = vstv %s1539_s0 }
0x12a5   : > { %2283 = vrsqrt.f32 %v1540_v50 }
0x12b2   : > { %v2284_v51 = vpop.eup %2283 }
0x12b3   : > { %2227 = vpush %v2284_v51  ;;  %v1709_v51 = vld [vmem:[%s2825_s4 + $0x8] sm:$0xff] }
0x12e4   : > { %s2228_s28 = spop %2227 }
0x12e5   : > { %v1545_v53 = vstv %s2228_s28  ;;  %s1988_s28 = sld [smem:[#allocation3 + $0x7]] }
0x12e6   : > { %v1546_v54 = vmul.f32 %v1973_v52, %v1545_v53 }
0x12e8   : > { %1549 = vperm.xlu0 %2273, %v1546_v54  }
0x12eb   : > { %v1846_v54 = vstv %s1988_s28 }
0x1363   : > { %v1550_v55 = vpop.permute.xlu0 %1549 }
0x1364   : > { %v1552_v56 = vmul.f32 %v1550_v55, %v1525_v41 }
0x1366   : > { %v1560_v60 = vadd.f32 %v1558_v57, %v1552_v56 }
0x1368   : > { %v1564_v61 = vmul.f32 %v1563_v58, %v1560_v60  ;;  %vm1562_vm10 = vcmp.ge.f32.partialorder %v1560_v60, 0.0 }
0x136a   : > { %v1565_v62 = vsel %vm1562_vm10, %v1560_v60, %v1564_v61 }
0x136b   : > { %2170 = vmatpush3.msra.mxu1 %v1565_v62 }
0x136c   : > { %2171 = vmatprep.subr.mxu1 %v2315_v0 }
0x136d   : > { %2172 = vmatpush3.msra.mxu1 %v2736_v22 }
0x136e   : > { %2173 = vmatprep.subr.mxu1 %v2315_v0 }
0x136f   : > { %2174 = vmatpush3.msra.mxu1 %v2692_v32 }
0x1370   : > { %2175 = vmatprep.subr.mxu1 %v2315_v0 }
0x1371   : > { %2176 = vmatpush3.msra.mxu1 %v2620_v23 }
0x1372   : > { %2177 = vmatprep.subr.mxu1 %v2315_v0 }
0x1373   : > { %2178 = vmatpush3.msra.mxu1 %v2553_v20 }
0x1374   : > { %2179 = vmatprep.subr.mxu1 %v2315_v0 }
0x1375   : > { %2180 = vmatpush3.msra.mxu1 %v2507_v37 }
0x1376   : > { %2182 = vmatmul.mubr.msk.f32.vlgmr.msra.gmra.mxu1 %vm728_vm3, %v1573_v63 }
0x1436   : > { %v1650_v32 = vpop.f32.mrf.mxu1 }
0x1437   : > { %v1651_v59 = vadd.f32 %v1650_v32, %v1579_v1 }
0x1438   : > { %v2183_v2 = vpop.f32.mrf.mxu1 }
0x1439   : > { %1654 = vadd.xlane.f32.xlu0 %v1651_v59 }
0x14c2   : > { %v1655_v23 = vpop.xlane.xlu0 %1654 }
0x14c3   : > { %v1656_v3 = vrot.slane %v1655_v23, 4 }
0x14c5   : > { %v1657_v4 = vadd.f32 %v1656_v3, %v1655_v23 }
0x14c7   : > { %v1658_v5 = vrot.slane %v1657_v4, 2 }
0x14c9   : > { %v1659_v20 = vadd.f32 %v1658_v5, %v1657_v4 }
0x14cb   : > { %v1660_v6 = vrot.slane %v1659_v20, 1 }
0x14cd   : > { %v1661_v7 = vadd.f32 %v1660_v6, %v1659_v20 }
0x14cf   : > { %2229 = vpush %v1661_v7 }
0x1500   : > { %s2230_s19 = spop %2229 }
0x1501   : > { %s1665_s23 = smul.f32 0.0009765625, %s2230_s19 }
0x1503   : > { %v1666_v0 = vstv %s1665_s23  ;;  %s2846_s23 = smov 120  }
0x1504   : > { %v1667_v8 = vsub.f32 %v1651_v59, %v1666_v0 }
0x1506   : > { %v1668_v37 = vmul.f32 %v1667_v8, %v1667_v8 }
0x1508   : > { %1669 = vadd.xlane.f32.xlu1 %v1668_v37 }
0x1519   : > { %1699 = vperm.xlu1 %2274, %v1979_v9  }
0x1591   : > { %v1670_v10 = vpop.xlane.xlu1 %1669 }
0x1592   : > { %v1671_v11 = vrot.slane %v1670_v10, 4 }
0x1594   : > { %v1672_v12 = vadd.f32 %v1671_v11, %v1670_v10 }
0x1595   : > { %v1700_v26 = vpop.permute.xlu1 %1699 }
0x1596   : > { %v1673_v13 = vrot.slane %v1672_v12, 2 }
0x1598   : > { %v1674_v14 = vadd.f32 %v1673_v13, %v1672_v12 }
0x159a   : > { %v1675_v15 = vrot.slane %v1674_v14, 1 }
0x159c   : > { %v1676_v16 = vadd.f32 %v1675_v15, %v1674_v14 }
0x159e   : > { %2231 = vpush %v1676_v16 }
0x15cf   : > { %s2232_s30 = spop %2231 }
0x15d0   : > { %s1680_s0 = smul.f32 0.0009765625, %s2232_s30 }
0x15d2   : > { %s1681_s17 = sadd.f32 1e-08, %s1680_s0 }
0x15d4   : > { %v1682_v17 = vstv %s1681_s17  ;;  %s2849_s17 = smov 9  }
0x15d5   : > { %2285 = vrsqrt.f32 %v1682_v17 }
0x15e2   : > { %v2286_v18 = vpop.eup %2285 }
0x15e3   : > { %2233 = vpush %v2286_v18 }
0x1614   : > { %s2234_s26 = spop %2233 }
0x1615   : > { %v1687_v21 = vstv %s2234_s26 }
0x1616   : > { %v1688_v22 = vmul.f32 %v1978_v19, %v1687_v21 }
0x1618   : > { %1691 = vperm.xlu0 %2273, %v1688_v22  }
0x1693   : > { %v1692_v24 = vpop.permute.xlu0 %1691 }
0x1694   : > { %v1694_v25 = vmul.f32 %v1692_v24, %v1667_v8 }
0x1696   : > { %v1702_v28 = vadd.f32 %v1700_v26, %v1694_v25 }
0x1698   : > { %vm1704_vm11 = vcmp.ge.f32.partialorder %v1702_v28, 0.0  ;;  %v1706_v29 = vmul.f32 %v1705_v27, %v1702_v28 }
0x169a   : > { %v1707_v30 = vsel %vm1704_vm11, %v1702_v28, %v1706_v29 }
0x169b   : > { %1736 = vrot.lane.b32.xlu1 %v1707_v30, %s2317_s20  ;;  %1744 = vrot.lane.b32.xlu0 %v1707_v30, %s2846_s23  ;;  %s2850_s20 = sshll.u32 %s2852_s22, 4 }
0x169c   : > { %s535_s29 = scalar_lea.vmem %s2837_s16, %s2850_s20 }
0x169f   : > { %1720 = vrot.lane.b32.xlu1 %v1707_v30, %s2847_s25  ;;  %1728 = vrot.lane.b32.xlu0 %v1707_v30, %s2848_s24 }
0x16a3   : > { %1754 = vperm.xlu1 %2274, %v1710_v33   ;;  %1712 = vrot.lane.b32.xlu0 %v1707_v30, %s2849_s17 }
0x16a7   : > { %1759 = vperm.xlu0 %2273, %v1711_v34  }
0x170d   : > { %v1737_v38 = vpop.permute.xlu1 %1736  ;;  %v1745_v39 = vpop.permute.xlu0 %1744 }
0x170e   : > { %v1751_v40 = vmul.f32 %v1985_v35, %v1745_v39  ;;  %v1743_v41 = vmul.f32 %v1984_v36, %v1737_v38 }
0x1710   : > { %2184 = vmatprep.subr.mxu0 %v1751_v40 }
0x1711   : > { %2185 = vmatpush3.msra.mxu0 %v1751_v40  ;;  %v1729_v43 = vpop.permute.xlu0 %1728  ;;  %v1721_v45 = vpop.permute.xlu1 %1720 }
0x1712   : > { %2186 = vmatprep.subr.mxu0 %v1743_v41  ;;  %v1735_v46 = vmul.f32 %v1983_v42, %v1729_v43  ;;  %v1727_v49 = vmul.f32 %v1982_v44, %v1721_v45 }
0x1713   : > { %2187 = vmatpush3.msra.mxu0 %v1743_v41 }
0x1714   : > { %2188 = vmatprep.subr.mxu0 %v1707_v30 }
0x1715   : > { %2189 = vmatpush3.msra.mxu0 %v1707_v30  ;;  %v1713_v48 = vpop.permute.xlu0 %1712 }
0x1716   : > { %2190 = vmatprep.subr.mxu0 %v1735_v46  ;;  %v1719_v50 = vmul.f32 %v1981_v47, %v1713_v48 }
0x1717   : > { %2191 = vmatpush3.msra.mxu0 %v1735_v46 }
0x1718   : > { %2192 = vmatprep.subr.mxu0 %v1727_v49 }
0x1719   : > { %2193 = vmatpush3.msra.mxu0 %v1727_v49 }
0x171a   : > { %2194 = vmatprep.subr.mxu0 %v1719_v50 }
0x171b   : > { %2195 = vmatpush3.msra.mxu0 %v1719_v50 }
0x171c   : > { %2197 = vmatmul.mubr.msk.f32.vlgmr.msra.gmra.mxu0 %vm728_vm3, %v1709_v51 }
0x171e   : > { %v1755_v56 = vpop.permute.xlu1 %1754 }
0x1722   : > { %v1760_v52 = vpop.permute.xlu0 %1759 }
0x17dc   : > { %v2198_v53 = vpop.f32.mrf.mxu0 }
0x17dd   : > { %v1840_v55 = vadd.f32 %v2198_v53, %v1760_v52 }
0x17de   : > { %v1834_v57 = vpop.f32.mrf.mxu0 }
0x17df   : > { %vm1845_vm12 = vcmp.ge.f32.partialorder %v1840_v55, 0.0  ;;  %v1848_v58 = vmul.f32 %v1846_v54, %v1840_v55  ;;  %v1835_v60 = vadd.f32 %v1834_v57, %v1755_v56 }
0x17e1   : > { %v1850_v61 = vsel %vm1845_vm12, %v1840_v55, %v1848_v58  ;;  %vm1844_vm13 = vcmp.ge.f32.partialorder %v1835_v60, 0.0  ;;  %v1847_v62 = vmul.f32 %v1846_v54, %v1835_v60 }
0x17e2   : > { %1852 = vst [vmem:[%s535_s29 + $0x8] sm:$0xff] %v1850_v61 }
0x17e3   : > { %v1849_v63 = vsel %vm1844_vm13, %v1835_v60, %v1847_v62 }
0x17e4   : > { %1851 = vst [vmem:[%s535_s29] sm:$0xff] %v1849_v63 }
0x17e5 PF: > { %s27_s21 = sadd.s32 1, %s2312_s21  }
0x17e6   : > { %p24_p1 = scmp.ge.s32.totalorder %s27_s21, 4  }
0x17e8   :  { %26 = sbr.rel (!%p24_p1) target bundleno = 3 (0x3), region = 134 }
0x17ed   :  { %1874 = vsyncpa [#allocation4], 1 }
0x17ee   :  { %1876 = vsyncpa [#allocation4 + $0x1], 1 }

</bundles_post_ra>
